<compile_context>
chip_gen: v6e
topology: v6e:2x2x1
jax: 0.10.0
libtpu: 0.0.40
codegen_flags: <defaults>
</compile_context>

<pallas_src>
import math
from functools import partial

import jax
import jax.numpy as jnp
from jax.experimental import pallas as pl
from jax.experimental.pallas import tpu as pltpu

EPS = 1e-12  # F.normalize eps

# memory-space enum (name-compatible across recent jax versions)
_MS = getattr(pltpu, "MemorySpace", None) or getattr(pltpu, "TPUMemorySpace")
_VMEM_SPACE = _MS.VMEM


def _l2norm(x):
    # F.normalize(x, p=2, dim=-1, eps=EPS): x / max(||x||_2, eps)
    # == x * rsqrt(max(sum(x^2), eps^2)); rsqrt routes to the EUP slot.
    ss = jnp.sum(x * x, axis=-1, keepdims=True)
    return x * jax.lax.rsqrt(jnp.maximum(ss, EPS * EPS))


def make_kernel(num_heads, tq):
    bf16 = jnp.bfloat16

    def kernel(h_ref,
               wq_ref, bq_ref, wk_ref, bk_ref, wv_ref, bv_ref,
               wo_ref, bo_ref, w1_ref, b1_ref, w2_ref, b2_ref,
               aa_ref, am_ref,
               out_ref,
               k_scr, v_scr, q_scr):
        qi = pl.program_id(1)

        # ---- K/V projection: ONCE per batch row (qi == 0), head-major bf16 ----
        @pl.when(qi == 0)
        def _():
            h_all_b = h_ref[0].astype(bf16)                       # (S, D)
            for hh in range(num_heads):
                k_h = jnp.dot(h_all_b, wk_ref[hh],
                              preferred_element_type=jnp.float32) + bk_ref[hh]
                v_h = jnp.dot(h_all_b, wv_ref[hh],
                              preferred_element_type=jnp.float32) + bv_ref[hh]
                k_scr[hh] = k_h.astype(bf16)                       # (S, hd)
                v_scr[hh] = v_h.astype(bf16)

        # ---- query / residual rows for this tile (single h stream) ----
        q_start = pl.multiple_of(qi * tq, tq)
        hq = h_ref[0, pl.ds(q_start, tq), :]                       # (tq, D) f32
        hq_b = hq.astype(bf16)

        # ---- Q projection, head-major (outer Linear + in_proj + scale folded) ----
        for hh in range(num_heads):
            q_h = jnp.dot(hq_b, wq_ref[hh],
                          preferred_element_type=jnp.float32) + bq_ref[hh]
            q_scr[hh] = q_h.astype(bf16)                           # (tq, hd)

        q3 = q_scr[...]                                            # (H, tq, hd) bf16
        k3 = k_scr[...]                                            # (H, S,  hd) bf16
        v3 = v_scr[...]                                            # (H, S,  hd) bf16

        # ---- batched attention over heads (no lane-splitting slices,
        #      no per-head accumulation chain) ----
        s = jnp.einsum("hqd,hkd->hqk", q3, k3,
                       preferred_element_type=jnp.float32)         # (H, tq, S)
        m = jnp.max(s, axis=-1, keepdims=True)
        e = jnp.exp(s - m)                                         # f32 softmax
        p = e * pl.reciprocal(jnp.sum(e, axis=-1, keepdims=True), approx=True)
        ctx = jnp.einsum("hqk,hkd->hqd", p.astype(bf16), v3,
                         preferred_element_type=jnp.float32)       # (H, tq, hd)
        per_head = jnp.einsum("hqd,hde->hqe", ctx.astype(bf16), wo_ref[...],
                              preferred_element_type=jnp.float32)  # (H, tq, D)
        attn_out = jnp.sum(per_head, axis=0) + bo_ref[...]         # (tq, D)

        # ---- normalized residual update (attention), f32 ----
        h_A = _l2norm(attn_out)
        h1 = _l2norm(hq + aa_ref[...] * (h_A - hq))

        # ---- FeedForward (dropout = identity in eval mode) ----
        z = jnp.dot(h1.astype(bf16), w1_ref[...],
                    preferred_element_type=jnp.float32) + b1_ref[...]
        z = jnp.maximum(z, 0.0)
        mlp = jnp.dot(z.astype(bf16), w2_ref[...],
                      preferred_element_type=jnp.float32) + b2_ref[...]

        # ---- normalized residual update (MLP), f32 ----
        h_M = _l2norm(mlp)
        h2 = _l2norm(h1 + am_ref[...] * (h_M - h1))
        out_ref[0] = h2.astype(out_ref.dtype)

    return kernel


def _vmem_limit_bytes(S, tq, D, FF, H, hd):
    # Generation-aware cap: ~85% of physical VMEM (headroom for compiler
    # scratch), never below 32 MiB.
    try:
        phys = int(pltpu.get_tpu_info().vmem_capacity_bytes)
    except Exception:
        phys = 128 * 1024 * 1024
    cap = int(phys * 0.85)
    bf, f4 = 2, 4
    weights = (3 * D * D + D * D + D * FF + FF * D) * bf           # single-resident
    biases = (4 * D + FF + 3 * D) * f4
    io = 2 * (S * D + tq * D) * f4                                 # h block + out block (dbl-buffered)
    scr = (2 * H * S * hd + H * tq * hd) * bf                      # k/v/q scratch
    work = (3 * H * tq * S + H * tq * D + tq * FF + 8 * tq * D) * f4
    est = weights + biases + io + scr + work
    return int(min(max(2 * est, 32 << 20), cap))


def fuse_params(p, num_heads):
    """Fold the outer q/k/v Linears into the MHA in_proj (and 1/sqrt(hd) into Q),
    re-layout head-major, cast to kernel dtypes.  Run ONCE per parameter set."""
    D = p["wq"].shape[0]
    hd = D // num_heads
    scale = 1.0 / math.sqrt(hd)
    f32, bf16 = jnp.float32, jnp.bfloat16

    def hm_w(w):   # (D, D) -> (H, D, hd)
        return jnp.transpose(w.reshape(D, num_heads, hd), (1, 0, 2))

    def hm_b(b):   # (1, D) -> (H, 1, hd)
        return jnp.transpose(b.reshape(1, num_heads, hd), (1, 0, 2))

    wq_eff = (p["wq"] @ p["wiq"]) * scale
    bq_eff = (p["bq"] @ p["wiq"] + p["biq"]) * scale
    wk_eff = p["wk"] @ p["wik"]
    bk_eff = p["bk"] @ p["wik"] + p["bik"]
    wv_eff = p["wv"] @ p["wiv"]
    bv_eff = p["bv"] @ p["wiv"] + p["biv"]

    return dict(
        wq=hm_w(wq_eff).astype(bf16), bq=hm_b(bq_eff).astype(f32),
        wk=hm_w(wk_eff).astype(bf16), bk=hm_b(bk_eff).astype(f32),
        wv=hm_w(wv_eff).astype(bf16), bv=hm_b(bv_eff).astype(f32),
        wo=p["wo"].reshape(num_heads, hd, D).astype(bf16),
        bo=p["bo"].astype(f32),
        w1=p["w1"].astype(bf16), b1=p["b1"].astype(f32),
        w2=p["w2"].astype(bf16), b2=p["b2"].astype(f32),
        alpha_a=p["alpha_a"].astype(f32), alpha_m=p["alpha_m"].astype(f32),
    )


@partial(jax.jit, static_argnames=("num_heads",))
def normalized_transformer_block(h, fused, num_heads):
    B, S, D = h.shape
    hd = D // num_heads
    FF = fused["w1"].shape[1]

    # query-row tile: up to 256 rows to fill the 256-wide MXU M dim (v6e/v7x)
    if S <= 256:
        tq = S
    elif S % 256 == 0:
        tq = 256
    else:
        tq = 128
        assert S % tq == 0, "sequence length must be a multiple of 128"
    nq = S // tq

    weight_spec = pl.BlockSpec(memory_space=_VMEM_SPACE)   # whole array, single-resident
    in_specs = [pl.BlockSpec((1, S, D), lambda b, qi: (b, 0, 0))] + [weight_spec] * 14

    return pl.pallas_call(
        make_kernel(num_heads, tq),
        out_shape=jax.ShapeDtypeStruct((B, S, D), h.dtype),
        grid=(B, nq),
        in_specs=in_specs,
        out_specs=pl.BlockSpec((1, tq, D), lambda b, qi: (b, qi, 0)),
        scratch_shapes=[
            pltpu.VMEM((num_heads, S, hd), jnp.bfloat16),    # K cache (head-major)
            pltpu.VMEM((num_heads, S, hd), jnp.bfloat16),    # V cache (head-major)
            pltpu.VMEM((num_heads, tq, hd), jnp.bfloat16),   # Q (head-major)
        ],
        compiler_params=pltpu.CompilerParams(
            # qi carries the per-batch KV scratch -> must be "arbitrary";
            # megacore shards on b only.
            dimension_semantics=("parallel", "arbitrary"),
            vmem_limit_bytes=_vmem_limit_bytes(S, tq, D, FF, num_heads, hd),
        ),
    )(h, fused["wq"], fused["bq"], fused["wk"], fused["bk"],
      fused["wv"], fused["bv"], fused["wo"], fused["bo"],
      fused["w1"], fused["b1"], fused["w2"], fused["b2"],
      fused["alpha_a"], fused["alpha_m"])


# ---------------- pure-JAX reference (mirrors PyTorch semantics, f32) --------
def reference(h, p, num_heads):
    B, S, D = h.shape
    hd = D // num_heads
    scale = 1.0 / math.sqrt(hd)

    def l2n(x):
        n = jnp.sqrt(jnp.sum(x * x, axis=-1, keepdims=True))
        return x / jnp.maximum(n, EPS)

    q = h @ p["wq"] + p["bq"]
    k = h @ p["wk"] + p["bk"]
    v = h @ p["wv"] + p["bv"]
    q2 = (q @ p["wiq"] + p["biq"]).reshape(B, S, num_heads, hd).transpose(0, 2, 1, 3)
    k2 = (k @ p["wik"] + p["bik"]).reshape(B, S, num_heads, hd).transpose(0, 2, 1, 3)
    v2 = (v @ p["wiv"] + p["biv"]).reshape(B, S, num_heads, hd).transpose(0, 2, 1, 3)
    s = jnp.einsum("bhqd,bhkd->bhqk", q2 * scale, k2)
    pr = jax.nn.softmax(s, axis=-1)
    ctx = jnp.einsum("bhqk,bhkd->bhqd", pr, v2).transpose(0, 2, 1, 3).reshape(B, S, D)
    attn_out = ctx @ p["wo"] + p["bo"]

    h_A = l2n(attn_out)
    h1 = l2n(h + p["alpha_a"] * (h_A - h))
    mlp = jnp.maximum(h1 @ p["w1"] + p["b1"], 0.0) @ p["w2"] + p["b2"]
    h_M = l2n(mlp)
    return l2n(h1 + p["alpha_m"] * (h_M - h1))


def init_params(key, embed_dim, ff_dim, alpha_A=0.1, alpha_M=0.1):
    def lin(k, din, dout):
        kw, kb = jax.random.split(k)
        w = jax.random.normal(kw, (din, dout), jnp.float32) * 0.05
        b = jax.random.normal(kb, (1, dout), jnp.float32) * 0.05
        return w, b

    keys = jax.random.split(key, 9)
    p = {}
    p["wq"], p["bq"] = lin(keys[0], embed_dim, embed_dim)
    p["wk"], p["bk"] = lin(keys[1], embed_dim, embed_dim)
    p["wv"], p["bv"] = lin(keys[2], embed_dim, embed_dim)
    p["wiq"], p["biq"] = lin(keys[3], embed_dim, embed_dim)
    p["wik"], p["bik"] = lin(keys[4], embed_dim, embed_dim)
    p["wiv"], p["biv"] = lin(keys[5], embed_dim, embed_dim)
    p["wo"], p["bo"] = lin(keys[6], embed_dim, embed_dim)
    p["w1"], p["b1"] = lin(keys[7], embed_dim, ff_dim)
    p["w2"], p["b2"] = lin(keys[8], ff_dim, embed_dim)
    p["alpha_a"] = jnp.full((1, embed_dim), alpha_A, jnp.float32)
    p["alpha_m"] = jnp.full((1, embed_dim), alpha_M, jnp.float32)
    return p


if __name__ == "__main__":
    B, S, D, H, FF = 2, 8, 32, 4, 64

    key = jax.random.PRNGKey(0)
    k_h, k_p = jax.random.split(key)
    h = jax.random.normal(k_h, (B, S, D), jnp.float32)
    params = init_params(k_p, D, FF)

    fused = fuse_params(params, H)                     # hoisted, done once
    out = normalized_transformer_block(h, fused, num_heads=H)
    out = jax.block_until_ready(out)

    ref = reference(h, params, H)
    assert out.shape == (B, S, D)
    # bf16 MXU compute + fused-weight rounding order -> relaxed tolerance
    assert bool(jnp.allclose(out, ref, atol=2e-2, rtol=2e-2)), "mismatch vs reference"

    print("KERNEL_OK")
</pallas_src>

<mosaic_0001>
module attributes {stable_mosaic.version = 11 : i64} {
  func.func @kernel(%arg0: i32, %arg1: i32, %arg2: memref<1x8x32xf32, #tpu.memory_space<vmem>>, %arg3: memref<4x32x8xbf16, #tpu.memory_space<vmem>>, %arg4: memref<4x1x8xf32, #tpu.memory_space<vmem>>, %arg5: memref<4x32x8xbf16, #tpu.memory_space<vmem>>, %arg6: memref<4x1x8xf32, #tpu.memory_space<vmem>>, %arg7: memref<4x32x8xbf16, #tpu.memory_space<vmem>>, %arg8: memref<4x1x8xf32, #tpu.memory_space<vmem>>, %arg9: memref<4x8x32xbf16, #tpu.memory_space<vmem>>, %arg10: memref<1x32xf32, #tpu.memory_space<vmem>>, %arg11: memref<32x64xbf16, #tpu.memory_space<vmem>>, %arg12: memref<1x64xf32, #tpu.memory_space<vmem>>, %arg13: memref<64x32xbf16, #tpu.memory_space<vmem>>, %arg14: memref<1x32xf32, #tpu.memory_space<vmem>>, %arg15: memref<1x32xf32, #tpu.memory_space<vmem>>, %arg16: memref<1x32xf32, #tpu.memory_space<vmem>>, %arg17: memref<1x8x32xf32, #tpu.memory_space<vmem>>, %arg18: memref<4x8x8xbf16, #tpu.memory_space<vmem>>, %arg19: memref<4x8x8xbf16, #tpu.memory_space<vmem>>, %arg20: memref<4x8x8xbf16, #tpu.memory_space<vmem>>) attributes {dimension_semantics = [#tpu.dimension_semantics<parallel>, #tpu.dimension_semantics<arbitrary>], iteration_bounds = array<i64: 2, 1>, scalar_prefetch = 0 : i64, scratch_operands = 3 : i64, tpu.core_type = #tpu.core_type<tc>, window_params = [{transform_indices = @transform_0, window_bounds = array<i64: 1, 8, 32>}, {pipeline_mode = #tpu.pipeline_mode<synchronous>, transform_indices = @transform_1, window_bounds = array<i64: 4, 32, 8>}, {pipeline_mode = #tpu.pipeline_mode<synchronous>, transform_indices = @transform_2, window_bounds = array<i64: 4, 1, 8>}, {pipeline_mode = #tpu.pipeline_mode<synchronous>, transform_indices = @transform_3, window_bounds = array<i64: 4, 32, 8>}, {pipeline_mode = #tpu.pipeline_mode<synchronous>, transform_indices = @transform_4, window_bounds = array<i64: 4, 1, 8>}, {pipeline_mode = #tpu.pipeline_mode<synchronous>, transform_indices = @transform_5, window_bounds = array<i64: 4, 32, 8>}, {pipeline_mode = #tpu.pipeline_mode<synchronous>, transform_indices = @transform_6, window_bounds = array<i64: 4, 1, 8>}, {pipeline_mode = #tpu.pipeline_mode<synchronous>, transform_indices = @transform_7, window_bounds = array<i64: 4, 8, 32>}, {pipeline_mode = #tpu.pipeline_mode<synchronous>, transform_indices = @transform_8, window_bounds = array<i64: 1, 32>}, {pipeline_mode = #tpu.pipeline_mode<synchronous>, transform_indices = @transform_9, window_bounds = array<i64: 32, 64>}, {pipeline_mode = #tpu.pipeline_mode<synchronous>, transform_indices = @transform_10, window_bounds = array<i64: 1, 64>}, {pipeline_mode = #tpu.pipeline_mode<synchronous>, transform_indices = @transform_11, window_bounds = array<i64: 64, 32>}, {pipeline_mode = #tpu.pipeline_mode<synchronous>, transform_indices = @transform_12, window_bounds = array<i64: 1, 32>}, {pipeline_mode = #tpu.pipeline_mode<synchronous>, transform_indices = @transform_13, window_bounds = array<i64: 1, 32>}, {pipeline_mode = #tpu.pipeline_mode<synchronous>, transform_indices = @transform_14, window_bounds = array<i64: 1, 32>}, {transform_indices = @transform_15, window_bounds = array<i64: 1, 8, 32>}]} {
    %c0_i32 = arith.constant 0 : i32
    %0 = arith.cmpi eq, %arg1, %c0_i32 : i32
    %1 = arith.extui %0 : i1 to i32
    %c0_i32_0 = arith.constant 0 : i32
    %2 = arith.cmpi ne, %1, %c0_i32_0 : i32
    scf.if %2 {
      %c0_84 = arith.constant 0 : index
      %c0_85 = arith.constant 0 : index
      %c0_86 = arith.constant 0 : index
      %135 = vector.load %arg2[%c0_84, %c0_85, %c0_86] : memref<1x8x32xf32, #tpu.memory_space<vmem>>, vector<1x8x32xf32>
      %136 = vector.shape_cast %135 : vector<1x8x32xf32> to vector<8x32xf32>
      %137 = arith.truncf %136 : vector<8x32xf32> to vector<8x32xbf16>
      %c0_87 = arith.constant 0 : index
      %c0_88 = arith.constant 0 : index
      %c0_89 = arith.constant 0 : index
      %138 = vector.load %arg5[%c0_87, %c0_88, %c0_89] : memref<4x32x8xbf16, #tpu.memory_space<vmem>>, vector<1x32x8xbf16>
      %139 = vector.shape_cast %138 : vector<1x32x8xbf16> to vector<32x8xbf16>
      %cst_90 = arith.constant dense<0.000000e+00> : vector<8x8xf32>
      %140 = tpu.matmul %137, %139, %cst_90 {dimension_numbers = #tpu.dot_dimension_numbers<[1], [0], [0], [1], [0, 0, 1, 1], [], []>} : vector<8x32xbf16>, vector<32x8xbf16>, vector<8x8xf32> -> vector<8x8xf32>
      %c0_91 = arith.constant 0 : index
      %c0_92 = arith.constant 0 : index
      %c0_93 = arith.constant 0 : index
      %141 = vector.load %arg6[%c0_91, %c0_92, %c0_93] : memref<4x1x8xf32, #tpu.memory_space<vmem>>, vector<1x1x8xf32>
      %142 = vector.shape_cast %141 : vector<1x1x8xf32> to vector<1x8xf32>
      %143 = vector.broadcast %142 : vector<1x8xf32> to vector<8x8xf32>
      %144 = arith.addf %140, %143 : vector<8x8xf32>
      %c0_94 = arith.constant 0 : index
      %c0_95 = arith.constant 0 : index
      %c0_96 = arith.constant 0 : index
      %145 = vector.load %arg7[%c0_94, %c0_95, %c0_96] : memref<4x32x8xbf16, #tpu.memory_space<vmem>>, vector<1x32x8xbf16>
      %146 = vector.shape_cast %145 : vector<1x32x8xbf16> to vector<32x8xbf16>
      %cst_97 = arith.constant dense<0.000000e+00> : vector<8x8xf32>
      %147 = tpu.matmul %137, %146, %cst_97 {dimension_numbers = #tpu.dot_dimension_numbers<[1], [0], [0], [1], [0, 0, 1, 1], [], []>} : vector<8x32xbf16>, vector<32x8xbf16>, vector<8x8xf32> -> vector<8x8xf32>
      %c0_98 = arith.constant 0 : index
      %c0_99 = arith.constant 0 : index
      %c0_100 = arith.constant 0 : index
      %148 = vector.load %arg8[%c0_98, %c0_99, %c0_100] : memref<4x1x8xf32, #tpu.memory_space<vmem>>, vector<1x1x8xf32>
      %149 = vector.shape_cast %148 : vector<1x1x8xf32> to vector<1x8xf32>
      %150 = vector.broadcast %149 : vector<1x8xf32> to vector<8x8xf32>
      %151 = arith.addf %147, %150 : vector<8x8xf32>
      %152 = arith.truncf %144 : vector<8x8xf32> to vector<8x8xbf16>
      %c0_101 = arith.constant 0 : index
      %c0_102 = arith.constant 0 : index
      %c0_103 = arith.constant 0 : index
      %153 = vector.load %arg18[%c0_101, %c0_102, %c0_103] : memref<4x8x8xbf16, #tpu.memory_space<vmem>>, vector<1x8x8xbf16>
      %154 = vector.shape_cast %153 : vector<1x8x8xbf16> to vector<8x8xbf16>
      %155 = vector.shape_cast %152 : vector<8x8xbf16> to vector<1x8x8xbf16>
      tpu.vector_store %arg18[%c0_101, %c0_102, %c0_103], %155 {strides = array<i32>} : memref<4x8x8xbf16, #tpu.memory_space<vmem>>, vector<1x8x8xbf16>,
      %156 = arith.truncf %151 : vector<8x8xf32> to vector<8x8xbf16>
      %c0_104 = arith.constant 0 : index
      %c0_105 = arith.constant 0 : index
      %c0_106 = arith.constant 0 : index
      %157 = vector.load %arg19[%c0_104, %c0_105, %c0_106] : memref<4x8x8xbf16, #tpu.memory_space<vmem>>, vector<1x8x8xbf16>
      %158 = vector.shape_cast %157 : vector<1x8x8xbf16> to vector<8x8xbf16>
      %159 = vector.shape_cast %156 : vector<8x8xbf16> to vector<1x8x8xbf16>
      tpu.vector_store %arg19[%c0_104, %c0_105, %c0_106], %159 {strides = array<i32>} : memref<4x8x8xbf16, #tpu.memory_space<vmem>>, vector<1x8x8xbf16>,
      %c1_107 = arith.constant 1 : index
      %c0_108 = arith.constant 0 : index
      %c0_109 = arith.constant 0 : index
      %160 = vector.load %arg5[%c1_107, %c0_108, %c0_109] : memref<4x32x8xbf16, #tpu.memory_space<vmem>>, vector<1x32x8xbf16>
      %161 = vector.shape_cast %160 : vector<1x32x8xbf16> to vector<32x8xbf16>
      %cst_110 = arith.constant dense<0.000000e+00> : vector<8x8xf32>
      %162 = tpu.matmul %137, %161, %cst_110 {dimension_numbers = #tpu.dot_dimension_numbers<[1], [0], [0], [1], [0, 0, 1, 1], [], []>} : vector<8x32xbf16>, vector<32x8xbf16>, vector<8x8xf32> -> vector<8x8xf32>
      %c1_111 = arith.constant 1 : index
      %c0_112 = arith.constant 0 : index
      %c0_113 = arith.constant 0 : index
      %163 = vector.load %arg6[%c1_111, %c0_112, %c0_113] : memref<4x1x8xf32, #tpu.memory_space<vmem>>, vector<1x1x8xf32>
      %164 = vector.shape_cast %163 : vector<1x1x8xf32> to vector<1x8xf32>
      %165 = vector.broadcast %164 : vector<1x8xf32> to vector<8x8xf32>
      %166 = arith.addf %162, %165 : vector<8x8xf32>
      %c1_114 = arith.constant 1 : index
      %c0_115 = arith.constant 0 : index
      %c0_116 = arith.constant 0 : index
      %167 = vector.load %arg7[%c1_114, %c0_115, %c0_116] : memref<4x32x8xbf16, #tpu.memory_space<vmem>>, vector<1x32x8xbf16>
      %168 = vector.shape_cast %167 : vector<1x32x8xbf16> to vector<32x8xbf16>
      %cst_117 = arith.constant dense<0.000000e+00> : vector<8x8xf32>
      %169 = tpu.matmul %137, %168, %cst_117 {dimension_numbers = #tpu.dot_dimension_numbers<[1], [0], [0], [1], [0, 0, 1, 1], [], []>} : vector<8x32xbf16>, vector<32x8xbf16>, vector<8x8xf32> -> vector<8x8xf32>
      %c1_118 = arith.constant 1 : index
      %c0_119 = arith.constant 0 : index
      %c0_120 = arith.constant 0 : index
      %170 = vector.load %arg8[%c1_118, %c0_119, %c0_120] : memref<4x1x8xf32, #tpu.memory_space<vmem>>, vector<1x1x8xf32>
      %171 = vector.shape_cast %170 : vector<1x1x8xf32> to vector<1x8xf32>
      %172 = vector.broadcast %171 : vector<1x8xf32> to vector<8x8xf32>
      %173 = arith.addf %169, %172 : vector<8x8xf32>
      %174 = arith.truncf %166 : vector<8x8xf32> to vector<8x8xbf16>
      %c1_121 = arith.constant 1 : index
      %c0_122 = arith.constant 0 : index
      %c0_123 = arith.constant 0 : index
      %175 = vector.load %arg18[%c1_121, %c0_122, %c0_123] : memref<4x8x8xbf16, #tpu.memory_space<vmem>>, vector<1x8x8xbf16>
      %176 = vector.shape_cast %175 : vector<1x8x8xbf16> to vector<8x8xbf16>
      %177 = vector.shape_cast %174 : vector<8x8xbf16> to vector<1x8x8xbf16>
      tpu.vector_store %arg18[%c1_121, %c0_122, %c0_123], %177 {strides = array<i32>} : memref<4x8x8xbf16, #tpu.memory_space<vmem>>, vector<1x8x8xbf16>,
      %178 = arith.truncf %173 : vector<8x8xf32> to vector<8x8xbf16>
      %c1_124 = arith.constant 1 : index
      %c0_125 = arith.constant 0 : index
      %c0_126 = arith.constant 0 : index
      %179 = vector.load %arg19[%c1_124, %c0_125, %c0_126] : memref<4x8x8xbf16, #tpu.memory_space<vmem>>, vector<1x8x8xbf16>
      %180 = vector.shape_cast %179 : vector<1x8x8xbf16> to vector<8x8xbf16>
      %181 = vector.shape_cast %178 : vector<8x8xbf16> to vector<1x8x8xbf16>
      tpu.vector_store %arg19[%c1_124, %c0_125, %c0_126], %181 {strides = array<i32>} : memref<4x8x8xbf16, #tpu.memory_space<vmem>>, vector<1x8x8xbf16>,
      %c2_127 = arith.constant 2 : index
      %c0_128 = arith.constant 0 : index
      %c0_129 = arith.constant 0 : index
      %182 = vector.load %arg5[%c2_127, %c0_128, %c0_129] : memref<4x32x8xbf16, #tpu.memory_space<vmem>>, vector<1x32x8xbf16>
      %183 = vector.shape_cast %182 : vector<1x32x8xbf16> to vector<32x8xbf16>
      %cst_130 = arith.constant dense<0.000000e+00> : vector<8x8xf32>
      %184 = tpu.matmul %137, %183, %cst_130 {dimension_numbers = #tpu.dot_dimension_numbers<[1], [0], [0], [1], [0, 0, 1, 1], [], []>} : vector<8x32xbf16>, vector<32x8xbf16>, vector<8x8xf32> -> vector<8x8xf32>
      %c2_131 = arith.constant 2 : index
      %c0_132 = arith.constant 0 : index
      %c0_133 = arith.constant 0 : index
      %185 = vector.load %arg6[%c2_131, %c0_132, %c0_133] : memref<4x1x8xf32, #tpu.memory_space<vmem>>, vector<1x1x8xf32>
      %186 = vector.shape_cast %185 : vector<1x1x8xf32> to vector<1x8xf32>
      %187 = vector.broadcast %186 : vector<1x8xf32> to vector<8x8xf32>
      %188 = arith.addf %184, %187 : vector<8x8xf32>
      %c2_134 = arith.constant 2 : index
      %c0_135 = arith.constant 0 : index
      %c0_136 = arith.constant 0 : index
      %189 = vector.load %arg7[%c2_134, %c0_135, %c0_136] : memref<4x32x8xbf16, #tpu.memory_space<vmem>>, vector<1x32x8xbf16>
      %190 = vector.shape_cast %189 : vector<1x32x8xbf16> to vector<32x8xbf16>
      %cst_137 = arith.constant dense<0.000000e+00> : vector<8x8xf32>
      %191 = tpu.matmul %137, %190, %cst_137 {dimension_numbers = #tpu.dot_dimension_numbers<[1], [0], [0], [1], [0, 0, 1, 1], [], []>} : vector<8x32xbf16>, vector<32x8xbf16>, vector<8x8xf32> -> vector<8x8xf32>
      %c2_138 = arith.constant 2 : index
      %c0_139 = arith.constant 0 : index
      %c0_140 = arith.constant 0 : index
      %192 = vector.load %arg8[%c2_138, %c0_139, %c0_140] : memref<4x1x8xf32, #tpu.memory_space<vmem>>, vector<1x1x8xf32>
      %193 = vector.shape_cast %192 : vector<1x1x8xf32> to vector<1x8xf32>
      %194 = vector.broadcast %193 : vector<1x8xf32> to vector<8x8xf32>
      %195 = arith.addf %191, %194 : vector<8x8xf32>
      %196 = arith.truncf %188 : vector<8x8xf32> to vector<8x8xbf16>
      %c2_141 = arith.constant 2 : index
      %c0_142 = arith.constant 0 : index
      %c0_143 = arith.constant 0 : index
      %197 = vector.load %arg18[%c2_141, %c0_142, %c0_143] : memref<4x8x8xbf16, #tpu.memory_space<vmem>>, vector<1x8x8xbf16>
      %198 = vector.shape_cast %197 : vector<1x8x8xbf16> to vector<8x8xbf16>
      %199 = vector.shape_cast %196 : vector<8x8xbf16> to vector<1x8x8xbf16>
      tpu.vector_store %arg18[%c2_141, %c0_142, %c0_143], %199 {strides = array<i32>} : memref<4x8x8xbf16, #tpu.memory_space<vmem>>, vector<1x8x8xbf16>,
      %200 = arith.truncf %195 : vector<8x8xf32> to vector<8x8xbf16>
      %c2_144 = arith.constant 2 : index
      %c0_145 = arith.constant 0 : index
      %c0_146 = arith.constant 0 : index
      %201 = vector.load %arg19[%c2_144, %c0_145, %c0_146] : memref<4x8x8xbf16, #tpu.memory_space<vmem>>, vector<1x8x8xbf16>
      %202 = vector.shape_cast %201 : vector<1x8x8xbf16> to vector<8x8xbf16>
      %203 = vector.shape_cast %200 : vector<8x8xbf16> to vector<1x8x8xbf16>
      tpu.vector_store %arg19[%c2_144, %c0_145, %c0_146], %203 {strides = array<i32>} : memref<4x8x8xbf16, #tpu.memory_space<vmem>>, vector<1x8x8xbf16>,
      %c3_147 = arith.constant 3 : index
      %c0_148 = arith.constant 0 : index
      %c0_149 = arith.constant 0 : index
      %204 = vector.load %arg5[%c3_147, %c0_148, %c0_149] : memref<4x32x8xbf16, #tpu.memory_space<vmem>>, vector<1x32x8xbf16>
      %205 = vector.shape_cast %204 : vector<1x32x8xbf16> to vector<32x8xbf16>
      %cst_150 = arith.constant dense<0.000000e+00> : vector<8x8xf32>
      %206 = tpu.matmul %137, %205, %cst_150 {dimension_numbers = #tpu.dot_dimension_numbers<[1], [0], [0], [1], [0, 0, 1, 1], [], []>} : vector<8x32xbf16>, vector<32x8xbf16>, vector<8x8xf32> -> vector<8x8xf32>
      %c3_151 = arith.constant 3 : index
      %c0_152 = arith.constant 0 : index
      %c0_153 = arith.constant 0 : index
      %207 = vector.load %arg6[%c3_151, %c0_152, %c0_153] : memref<4x1x8xf32, #tpu.memory_space<vmem>>, vector<1x1x8xf32>
      %208 = vector.shape_cast %207 : vector<1x1x8xf32> to vector<1x8xf32>
      %209 = vector.broadcast %208 : vector<1x8xf32> to vector<8x8xf32>
      %210 = arith.addf %206, %209 : vector<8x8xf32>
      %c3_154 = arith.constant 3 : index
      %c0_155 = arith.constant 0 : index
      %c0_156 = arith.constant 0 : index
      %211 = vector.load %arg7[%c3_154, %c0_155, %c0_156] : memref<4x32x8xbf16, #tpu.memory_space<vmem>>, vector<1x32x8xbf16>
      %212 = vector.shape_cast %211 : vector<1x32x8xbf16> to vector<32x8xbf16>
      %cst_157 = arith.constant dense<0.000000e+00> : vector<8x8xf32>
      %213 = tpu.matmul %137, %212, %cst_157 {dimension_numbers = #tpu.dot_dimension_numbers<[1], [0], [0], [1], [0, 0, 1, 1], [], []>} : vector<8x32xbf16>, vector<32x8xbf16>, vector<8x8xf32> -> vector<8x8xf32>
      %c3_158 = arith.constant 3 : index
      %c0_159 = arith.constant 0 : index
      %c0_160 = arith.constant 0 : index
      %214 = vector.load %arg8[%c3_158, %c0_159, %c0_160] : memref<4x1x8xf32, #tpu.memory_space<vmem>>, vector<1x1x8xf32>
      %215 = vector.shape_cast %214 : vector<1x1x8xf32> to vector<1x8xf32>
      %216 = vector.broadcast %215 : vector<1x8xf32> to vector<8x8xf32>
      %217 = arith.addf %213, %216 : vector<8x8xf32>
      %218 = arith.truncf %210 : vector<8x8xf32> to vector<8x8xbf16>
      %c3_161 = arith.constant 3 : index
      %c0_162 = arith.constant 0 : index
      %c0_163 = arith.constant 0 : index
      %219 = vector.load %arg18[%c3_161, %c0_162, %c0_163] : memref<4x8x8xbf16, #tpu.memory_space<vmem>>, vector<1x8x8xbf16>
      %220 = vector.shape_cast %219 : vector<1x8x8xbf16> to vector<8x8xbf16>
      %221 = vector.shape_cast %218 : vector<8x8xbf16> to vector<1x8x8xbf16>
      tpu.vector_store %arg18[%c3_161, %c0_162, %c0_163], %221 {strides = array<i32>} : memref<4x8x8xbf16, #tpu.memory_space<vmem>>, vector<1x8x8xbf16>,
      %222 = arith.truncf %217 : vector<8x8xf32> to vector<8x8xbf16>
      %c3_164 = arith.constant 3 : index
      %c0_165 = arith.constant 0 : index
      %c0_166 = arith.constant 0 : index
      %223 = vector.load %arg19[%c3_164, %c0_165, %c0_166] : memref<4x8x8xbf16, #tpu.memory_space<vmem>>, vector<1x8x8xbf16>
      %224 = vector.shape_cast %223 : vector<1x8x8xbf16> to vector<8x8xbf16>
      %225 = vector.shape_cast %222 : vector<8x8xbf16> to vector<1x8x8xbf16>
      tpu.vector_store %arg19[%c3_164, %c0_165, %c0_166], %225 {strides = array<i32>} : memref<4x8x8xbf16, #tpu.memory_space<vmem>>, vector<1x8x8xbf16>,
    } else {
    }
    %c8_i32 = arith.constant 8 : i32
    %3 = arith.muli %arg1, %c8_i32 : i32
    %4 = tpu.assume_multiple %3, 8 : i32
    %c0 = arith.constant 0 : index
    %5 = arith.index_cast %4 : i32 to index
    %c0_1 = arith.constant 0 : index
    %6 = vector.load %arg2[%c0, %5, %c0_1] : memref<1x8x32xf32, #tpu.memory_space<vmem>>, vector<1x8x32xf32>
    %7 = vector.shape_cast %6 : vector<1x8x32xf32> to vector<8x32xf32>
    %8 = arith.truncf %7 : vector<8x32xf32> to vector<8x32xbf16>
    %c0_2 = arith.constant 0 : index
    %c0_3 = arith.constant 0 : index
    %c0_4 = arith.constant 0 : index
    %9 = vector.load %arg3[%c0_2, %c0_3, %c0_4] : memref<4x32x8xbf16, #tpu.memory_space<vmem>>, vector<1x32x8xbf16>
    %10 = vector.shape_cast %9 : vector<1x32x8xbf16> to vector<32x8xbf16>
    %cst = arith.constant dense<0.000000e+00> : vector<8x8xf32>
    %11 = tpu.matmul %8, %10, %cst {dimension_numbers = #tpu.dot_dimension_numbers<[1], [0], [0], [1], [0, 0, 1, 1], [], []>} : vector<8x32xbf16>, vector<32x8xbf16>, vector<8x8xf32> -> vector<8x8xf32>
    %c0_5 = arith.constant 0 : index
    %c0_6 = arith.constant 0 : index
    %c0_7 = arith.constant 0 : index
    %12 = vector.load %arg4[%c0_5, %c0_6, %c0_7] : memref<4x1x8xf32, #tpu.memory_space<vmem>>, vector<1x1x8xf32>
    %13 = vector.shape_cast %12 : vector<1x1x8xf32> to vector<1x8xf32>
    %14 = vector.broadcast %13 : vector<1x8xf32> to vector<8x8xf32>
    %15 = arith.addf %11, %14 : vector<8x8xf32>
    %16 = arith.truncf %15 : vector<8x8xf32> to vector<8x8xbf16>
    %c0_8 = arith.constant 0 : index
    %c0_9 = arith.constant 0 : index
    %c0_10 = arith.constant 0 : index
    %17 = vector.load %arg20[%c0_8, %c0_9, %c0_10] : memref<4x8x8xbf16, #tpu.memory_space<vmem>>, vector<1x8x8xbf16>
    %18 = vector.shape_cast %17 : vector<1x8x8xbf16> to vector<8x8xbf16>
    %19 = vector.shape_cast %16 : vector<8x8xbf16> to vector<1x8x8xbf16>
    tpu.vector_store %arg20[%c0_8, %c0_9, %c0_10], %19 {strides = array<i32>} : memref<4x8x8xbf16, #tpu.memory_space<vmem>>, vector<1x8x8xbf16>,
    %c1 = arith.constant 1 : index
    %c0_11 = arith.constant 0 : index
    %c0_12 = arith.constant 0 : index
    %20 = vector.load %arg3[%c1, %c0_11, %c0_12] : memref<4x32x8xbf16, #tpu.memory_space<vmem>>, vector<1x32x8xbf16>
    %21 = vector.shape_cast %20 : vector<1x32x8xbf16> to vector<32x8xbf16>
    %cst_13 = arith.constant dense<0.000000e+00> : vector<8x8xf32>
    %22 = tpu.matmul %8, %21, %cst_13 {dimension_numbers = #tpu.dot_dimension_numbers<[1], [0], [0], [1], [0, 0, 1, 1], [], []>} : vector<8x32xbf16>, vector<32x8xbf16>, vector<8x8xf32> -> vector<8x8xf32>
    %c1_14 = arith.constant 1 : index
    %c0_15 = arith.constant 0 : index
    %c0_16 = arith.constant 0 : index
    %23 = vector.load %arg4[%c1_14, %c0_15, %c0_16] : memref<4x1x8xf32, #tpu.memory_space<vmem>>, vector<1x1x8xf32>
    %24 = vector.shape_cast %23 : vector<1x1x8xf32> to vector<1x8xf32>
    %25 = vector.broadcast %24 : vector<1x8xf32> to vector<8x8xf32>
    %26 = arith.addf %22, %25 : vector<8x8xf32>
    %27 = arith.truncf %26 : vector<8x8xf32> to vector<8x8xbf16>
    %c1_17 = arith.constant 1 : index
    %c0_18 = arith.constant 0 : index
    %c0_19 = arith.constant 0 : index
    %28 = vector.load %arg20[%c1_17, %c0_18, %c0_19] : memref<4x8x8xbf16, #tpu.memory_space<vmem>>, vector<1x8x8xbf16>
    %29 = vector.shape_cast %28 : vector<1x8x8xbf16> to vector<8x8xbf16>
    %30 = vector.shape_cast %27 : vector<8x8xbf16> to vector<1x8x8xbf16>
    tpu.vector_store %arg20[%c1_17, %c0_18, %c0_19], %30 {strides = array<i32>} : memref<4x8x8xbf16, #tpu.memory_space<vmem>>, vector<1x8x8xbf16>,
    %c2 = arith.constant 2 : index
    %c0_20 = arith.constant 0 : index
    %c0_21 = arith.constant 0 : index
    %31 = vector.load %arg3[%c2, %c0_20, %c0_21] : memref<4x32x8xbf16, #tpu.memory_space<vmem>>, vector<1x32x8xbf16>
    %32 = vector.shape_cast %31 : vector<1x32x8xbf16> to vector<32x8xbf16>
    %cst_22 = arith.constant dense<0.000000e+00> : vector<8x8xf32>
    %33 = tpu.matmul %8, %32, %cst_22 {dimension_numbers = #tpu.dot_dimension_numbers<[1], [0], [0], [1], [0, 0, 1, 1], [], []>} : vector<8x32xbf16>, vector<32x8xbf16>, vector<8x8xf32> -> vector<8x8xf32>
    %c2_23 = arith.constant 2 : index
    %c0_24 = arith.constant 0 : index
    %c0_25 = arith.constant 0 : index
    %34 = vector.load %arg4[%c2_23, %c0_24, %c0_25] : memref<4x1x8xf32, #tpu.memory_space<vmem>>, vector<1x1x8xf32>
    %35 = vector.shape_cast %34 : vector<1x1x8xf32> to vector<1x8xf32>
    %36 = vector.broadcast %35 : vector<1x8xf32> to vector<8x8xf32>
    %37 = arith.addf %33, %36 : vector<8x8xf32>
    %38 = arith.truncf %37 : vector<8x8xf32> to vector<8x8xbf16>
    %c2_26 = arith.constant 2 : index
    %c0_27 = arith.constant 0 : index
    %c0_28 = arith.constant 0 : index
    %39 = vector.load %arg20[%c2_26, %c0_27, %c0_28] : memref<4x8x8xbf16, #tpu.memory_space<vmem>>, vector<1x8x8xbf16>
    %40 = vector.shape_cast %39 : vector<1x8x8xbf16> to vector<8x8xbf16>
    %41 = vector.shape_cast %38 : vector<8x8xbf16> to vector<1x8x8xbf16>
    tpu.vector_store %arg20[%c2_26, %c0_27, %c0_28], %41 {strides = array<i32>} : memref<4x8x8xbf16, #tpu.memory_space<vmem>>, vector<1x8x8xbf16>,
    %c3 = arith.constant 3 : index
    %c0_29 = arith.constant 0 : index
    %c0_30 = arith.constant 0 : index
    %42 = vector.load %arg3[%c3, %c0_29, %c0_30] : memref<4x32x8xbf16, #tpu.memory_space<vmem>>, vector<1x32x8xbf16>
    %43 = vector.shape_cast %42 : vector<1x32x8xbf16> to vector<32x8xbf16>
    %cst_31 = arith.constant dense<0.000000e+00> : vector<8x8xf32>
    %44 = tpu.matmul %8, %43, %cst_31 {dimension_numbers = #tpu.dot_dimension_numbers<[1], [0], [0], [1], [0, 0, 1, 1], [], []>} : vector<8x32xbf16>, vector<32x8xbf16>, vector<8x8xf32> -> vector<8x8xf32>
    %c3_32 = arith.constant 3 : index
    %c0_33 = arith.constant 0 : index
    %c0_34 = arith.constant 0 : index
    %45 = vector.load %arg4[%c3_32, %c0_33, %c0_34] : memref<4x1x8xf32, #tpu.memory_space<vmem>>, vector<1x1x8xf32>
    %46 = vector.shape_cast %45 : vector<1x1x8xf32> to vector<1x8xf32>
    %47 = vector.broadcast %46 : vector<1x8xf32> to vector<8x8xf32>
    %48 = arith.addf %44, %47 : vector<8x8xf32>
    %49 = arith.truncf %48 : vector<8x8xf32> to vector<8x8xbf16>
    %c3_35 = arith.constant 3 : index
    %c0_36 = arith.constant 0 : index
    %c0_37 = arith.constant 0 : index
    %50 = vector.load %arg20[%c3_35, %c0_36, %c0_37] : memref<4x8x8xbf16, #tpu.memory_space<vmem>>, vector<1x8x8xbf16>
    %51 = vector.shape_cast %50 : vector<1x8x8xbf16> to vector<8x8xbf16>
    %52 = vector.shape_cast %49 : vector<8x8xbf16> to vector<1x8x8xbf16>
    tpu.vector_store %arg20[%c3_35, %c0_36, %c0_37], %52 {strides = array<i32>} : memref<4x8x8xbf16, #tpu.memory_space<vmem>>, vector<1x8x8xbf16>,
    %c0_38 = arith.constant 0 : index
    %c0_39 = arith.constant 0 : index
    %c0_40 = arith.constant 0 : index
    %53 = vector.load %arg20[%c0_38, %c0_39, %c0_40] : memref<4x8x8xbf16, #tpu.memory_space<vmem>>, vector<4x8x8xbf16>
    %c0_41 = arith.constant 0 : index
    %c0_42 = arith.constant 0 : index
    %c0_43 = arith.constant 0 : index
    %54 = vector.load %arg18[%c0_41, %c0_42, %c0_43] : memref<4x8x8xbf16, #tpu.memory_space<vmem>>, vector<4x8x8xbf16>
    %c0_44 = arith.constant 0 : index
    %c0_45 = arith.constant 0 : index
    %c0_46 = arith.constant 0 : index
    %55 = vector.load %arg19[%c0_44, %c0_45, %c0_46] : memref<4x8x8xbf16, #tpu.memory_space<vmem>>, vector<4x8x8xbf16>
    "tpu.trace_start"() <{level = 10 : i32, message = "hqd,hkd->hqk"}> : () -> ()
    %cst_47 = arith.constant dense<0.000000e+00> : vector<4x8x8xf32>
    %56 = tpu.matmul %53, %54, %cst_47 {dimension_numbers = #tpu.dot_dimension_numbers<[2], [2], [1], [1], [0, 0, 0, 1, 1, 1], [0], [0]>} : vector<4x8x8xbf16>, vector<4x8x8xbf16>, vector<4x8x8xf32> -> vector<4x8x8xf32>
    "tpu.trace_stop"() : () -> ()
    %cst_48 = arith.constant dense<0xFF800000> : vector<4x8xf32>
    %57 = vector.multi_reduction <maximumf>, %56, %cst_48 [2] : vector<4x8x8xf32> to vector<4x8xf32>
    %58 = vector.shape_cast %57 : vector<4x8xf32> to vector<4x8x1xf32>
    %59 = vector.broadcast %58 : vector<4x8x1xf32> to vector<4x8x8xf32>
    %60 = arith.subf %56, %59 : vector<4x8x8xf32>
    %61 = math.exp %60 : vector<4x8x8xf32>
    %cst_49 = arith.constant dense<0.000000e+00> : vector<4x8xf32>
    %62 = vector.multi_reduction <add>, %61, %cst_49 [2] : vector<4x8x8xf32> to vector<4x8xf32>
    %63 = vector.shape_cast %62 : vector<4x8xf32> to vector<4x8x1xf32>
    %64 = tpu.reciprocal %63 {approx = true} : vector<4x8x1xf32> -> vector<4x8x1xf32>
    %65 = vector.broadcast %64 : vector<4x8x1xf32> to vector<4x8x8xf32>
    %66 = arith.mulf %61, %65 : vector<4x8x8xf32>
    %67 = arith.truncf %66 : vector<4x8x8xf32> to vector<4x8x8xbf16>
    "tpu.trace_start"() <{level = 10 : i32, message = "hqk,hkd->hqd"}> : () -> ()
    %cst_50 = arith.constant dense<0.000000e+00> : vector<4x8x8xf32>
    %68 = tpu.matmul %67, %55, %cst_50 {dimension_numbers = #tpu.dot_dimension_numbers<[2], [1], [1], [2], [0, 0, 0, 1, 1, 2], [0], [0]>} : vector<4x8x8xbf16>, vector<4x8x8xbf16>, vector<4x8x8xf32> -> vector<4x8x8xf32>
    "tpu.trace_stop"() : () -> ()
    %69 = arith.truncf %68 : vector<4x8x8xf32> to vector<4x8x8xbf16>
    %c0_51 = arith.constant 0 : index
    %c0_52 = arith.constant 0 : index
    %c0_53 = arith.constant 0 : index
    %70 = vector.load %arg9[%c0_51, %c0_52, %c0_53] : memref<4x8x32xbf16, #tpu.memory_space<vmem>>, vector<4x8x32xbf16>
    "tpu.trace_start"() <{level = 10 : i32, message = "hqd,hde->hqe"}> : () -> ()
    %cst_54 = arith.constant dense<0.000000e+00> : vector<4x8x32xf32>
    %71 = tpu.matmul %69, %70, %cst_54 {dimension_numbers = #tpu.dot_dimension_numbers<[2], [1], [1], [2], [0, 0, 0, 1, 1, 2], [0], [0]>} : vector<4x8x8xbf16>, vector<4x8x32xbf16>, vector<4x8x32xf32> -> vector<4x8x32xf32>
    "tpu.trace_stop"() : () -> ()
    %cst_55 = arith.constant dense<0.000000e+00> : vector<8x32xf32>
    %72 = vector.multi_reduction <add>, %71, %cst_55 [0] : vector<4x8x32xf32> to vector<8x32xf32>
    %c0_56 = arith.constant 0 : index
    %c0_57 = arith.constant 0 : index
    %73 = vector.load %arg10[%c0_56, %c0_57] : memref<1x32xf32, #tpu.memory_space<vmem>>, vector<1x32xf32>
    %74 = vector.broadcast %73 : vector<1x32xf32> to vector<8x32xf32>
    %75 = arith.addf %72, %74 : vector<8x32xf32>
    %76 = arith.mulf %75, %75 : vector<8x32xf32>
    %cst_58 = arith.constant dense<0.000000e+00> : vector<8xf32>
    %77 = vector.multi_reduction <add>, %76, %cst_58 [1] : vector<8x32xf32> to vector<8xf32>
    %78 = vector.shape_cast %77 : vector<8xf32> to vector<8x1xf32>
    %cst_59 = arith.constant 1.000000e-24 : f32
    %79 = vector.broadcast %cst_59 : f32 to vector<8x1xf32>
    %80 = arith.maximumf %78, %79 : vector<8x1xf32>
    %81 = math.rsqrt %80 : vector<8x1xf32>
    %82 = vector.broadcast %81 : vector<8x1xf32> to vector<8x32xf32>
    %83 = arith.mulf %75, %82 : vector<8x32xf32>
    %c0_60 = arith.constant 0 : index
    %c0_61 = arith.constant 0 : index
    %84 = vector.load %arg15[%c0_60, %c0_61] : memref<1x32xf32, #tpu.memory_space<vmem>>, vector<1x32xf32>
    %85 = arith.subf %83, %7 : vector<8x32xf32>
    %86 = vector.broadcast %84 : vector<1x32xf32> to vector<8x32xf32>
    %87 = arith.mulf %86, %85 : vector<8x32xf32>
    %88 = arith.addf %7, %87 : vector<8x32xf32>
    %89 = arith.mulf %88, %88 : vector<8x32xf32>
    %cst_62 = arith.constant dense<0.000000e+00> : vector<8xf32>
    %90 = vector.multi_reduction <add>, %89, %cst_62 [1] : vector<8x32xf32> to vector<8xf32>
    %91 = vector.shape_cast %90 : vector<8xf32> to vector<8x1xf32>
    %cst_63 = arith.constant 1.000000e-24 : f32
    %92 = vector.broadcast %cst_63 : f32 to vector<8x1xf32>
    %93 = arith.maximumf %91, %92 : vector<8x1xf32>
    %94 = math.rsqrt %93 : vector<8x1xf32>
    %95 = vector.broadcast %94 : vector<8x1xf32> to vector<8x32xf32>
    %96 = arith.mulf %88, %95 : vector<8x32xf32>
    %97 = arith.truncf %96 : vector<8x32xf32> to vector<8x32xbf16>
    %c0_64 = arith.constant 0 : index
    %c0_65 = arith.constant 0 : index
    %98 = vector.load %arg11[%c0_64, %c0_65] : memref<32x64xbf16, #tpu.memory_space<vmem>>, vector<32x64xbf16>
    %cst_66 = arith.constant dense<0.000000e+00> : vector<8x64xf32>
    %99 = tpu.matmul %97, %98, %cst_66 {dimension_numbers = #tpu.dot_dimension_numbers<[1], [0], [0], [1], [0, 0, 1, 1], [], []>} : vector<8x32xbf16>, vector<32x64xbf16>, vector<8x64xf32> -> vector<8x64xf32>
    %c0_67 = arith.constant 0 : index
    %c0_68 = arith.constant 0 : index
    %100 = vector.load %arg12[%c0_67, %c0_68] : memref<1x64xf32, #tpu.memory_space<vmem>>, vector<1x64xf32>
    %101 = vector.broadcast %100 : vector<1x64xf32> to vector<8x64xf32>
    %102 = arith.addf %99, %101 : vector<8x64xf32>
    %cst_69 = arith.constant 0.000000e+00 : f32
    %103 = vector.broadcast %cst_69 : f32 to vector<8x64xf32>
    %104 = arith.maximumf %102, %103 : vector<8x64xf32>
    %105 = arith.truncf %104 : vector<8x64xf32> to vector<8x64xbf16>
    %c0_70 = arith.constant 0 : index
    %c0_71 = arith.constant 0 : index
    %106 = vector.load %arg13[%c0_70, %c0_71] : memref<64x32xbf16, #tpu.memory_space<vmem>>, vector<64x32xbf16>
    %cst_72 = arith.constant dense<0.000000e+00> : vector<8x32xf32>
    %107 = tpu.matmul %105, %106, %cst_72 {dimension_numbers = #tpu.dot_dimension_numbers<[1], [0], [0], [1], [0, 0, 1, 1], [], []>} : vector<8x64xbf16>, vector<64x32xbf16>, vector<8x32xf32> -> vector<8x32xf32>
    %c0_73 = arith.constant 0 : index
    %c0_74 = arith.constant 0 : index
    %108 = vector.load %arg14[%c0_73, %c0_74] : memref<1x32xf32, #tpu.memory_space<vmem>>, vector<1x32xf32>
    %109 = vector.broadcast %108 : vector<1x32xf32> to vector<8x32xf32>
    %110 = arith.addf %107, %109 : vector<8x32xf32>
    %111 = arith.mulf %110, %110 : vector<8x32xf32>
    %cst_75 = arith.constant dense<0.000000e+00> : vector<8xf32>
    %112 = vector.multi_reduction <add>, %111, %cst_75 [1] : vector<8x32xf32> to vector<8xf32>
    %113 = vector.shape_cast %112 : vector<8xf32> to vector<8x1xf32>
    %cst_76 = arith.constant 1.000000e-24 : f32
    %114 = vector.broadcast %cst_76 : f32 to vector<8x1xf32>
    %115 = arith.maximumf %113, %114 : vector<8x1xf32>
    %116 = math.rsqrt %115 : vector<8x1xf32>
    %117 = vector.broadcast %116 : vector<8x1xf32> to vector<8x32xf32>
    %118 = arith.mulf %110, %117 : vector<8x32xf32>
    %c0_77 = arith.constant 0 : index
    %c0_78 = arith.constant 0 : index
    %119 = vector.load %arg16[%c0_77, %c0_78] : memref<1x32xf32, #tpu.memory_space<vmem>>, vector<1x32xf32>
    %120 = arith.subf %118, %96 : vector<8x32xf32>
    %121 = vector.broadcast %119 : vector<1x32xf32> to vector<8x32xf32>
    %122 = arith.mulf %121, %120 : vector<8x32xf32>
    %123 = arith.addf %96, %122 : vector<8x32xf32>
    %124 = arith.mulf %123, %123 : vector<8x32xf32>
    %cst_79 = arith.constant dense<0.000000e+00> : vector<8xf32>
    %125 = vector.multi_reduction <add>, %124, %cst_79 [1] : vector<8x32xf32> to vector<8xf32>
    %126 = vector.shape_cast %125 : vector<8xf32> to vector<8x1xf32>
    %cst_80 = arith.constant 1.000000e-24 : f32
    %127 = vector.broadcast %cst_80 : f32 to vector<8x1xf32>
    %128 = arith.maximumf %126, %127 : vector<8x1xf32>
    %129 = math.rsqrt %128 : vector<8x1xf32>
    %130 = vector.broadcast %129 : vector<8x1xf32> to vector<8x32xf32>
    %131 = arith.mulf %123, %130 : vector<8x32xf32>
    %c0_81 = arith.constant 0 : index
    %c0_82 = arith.constant 0 : index
    %c0_83 = arith.constant 0 : index
    %132 = vector.load %arg17[%c0_81, %c0_82, %c0_83] : memref<1x8x32xf32, #tpu.memory_space<vmem>>, vector<1x8x32xf32>
    %133 = vector.shape_cast %132 : vector<1x8x32xf32> to vector<8x32xf32>
    %134 = vector.shape_cast %131 : vector<8x32xf32> to vector<1x8x32xf32>
    tpu.vector_store %arg17[%c0_81, %c0_82, %c0_83], %134 {strides = array<i32>} : memref<1x8x32xf32, #tpu.memory_space<vmem>>, vector<1x8x32xf32>,
    return
  }
  func.func @transform_0(%arg0: i32, %arg1: i32) -> (i32, i32, i32) {
    %c0_i32 = arith.constant 0 : i32
    %c0_i32_0 = arith.constant 0 : i32
    %c0_i32_1 = arith.constant 0 : i32
    return %arg0, %c0_i32, %c0_i32_0 : i32, i32, i32
  }
  func.func @transform_1(%arg0: i32, %arg1: i32) -> (i32, i32, i32) {
    %c0_i32 = arith.constant 0 : i32
    %c0_i32_0 = arith.constant 0 : i32
    %c0_i32_1 = arith.constant 0 : i32
    %c0_i32_2 = arith.constant 0 : i32
    return %c0_i32, %c0_i32_0, %c0_i32_1 : i32, i32, i32
  }
  func.func @transform_2(%arg0: i32, %arg1: i32) -> (i32, i32, i32) {
    %c0_i32 = arith.constant 0 : i32
    %c0_i32_0 = arith.constant 0 : i32
    %c0_i32_1 = arith.constant 0 : i32
    %c0_i32_2 = arith.constant 0 : i32
    return %c0_i32, %c0_i32_0, %c0_i32_1 : i32, i32, i32
  }
  func.func @transform_3(%arg0: i32, %arg1: i32) -> (i32, i32, i32) {
    %c0_i32 = arith.constant 0 : i32
    %c0_i32_0 = arith.constant 0 : i32
    %c0_i32_1 = arith.constant 0 : i32
    %c0_i32_2 = arith.constant 0 : i32
    return %c0_i32, %c0_i32_0, %c0_i32_1 : i32, i32, i32
  }
  func.func @transform_4(%arg0: i32, %arg1: i32) -> (i32, i32, i32) {
    %c0_i32 = arith.constant 0 : i32
    %c0_i32_0 = arith.constant 0 : i32
    %c0_i32_1 = arith.constant 0 : i32
    %c0_i32_2 = arith.constant 0 : i32
    return %c0_i32, %c0_i32_0, %c0_i32_1 : i32, i32, i32
  }
  func.func @transform_5(%arg0: i32, %arg1: i32) -> (i32, i32, i32) {
    %c0_i32 = arith.constant 0 : i32
    %c0_i32_0 = arith.constant 0 : i32
    %c0_i32_1 = arith.constant 0 : i32
    %c0_i32_2 = arith.constant 0 : i32
    return %c0_i32, %c0_i32_0, %c0_i32_1 : i32, i32, i32
  }
  func.func @transform_6(%arg0: i32, %arg1: i32) -> (i32, i32, i32) {
    %c0_i32 = arith.constant 0 : i32
    %c0_i32_0 = arith.constant 0 : i32
    %c0_i32_1 = arith.constant 0 : i32
    %c0_i32_2 = arith.constant 0 : i32
    return %c0_i32, %c0_i32_0, %c0_i32_1 : i32, i32, i32
  }
  func.func @transform_7(%arg0: i32, %arg1: i32) -> (i32, i32, i32) {
    %c0_i32 = arith.constant 0 : i32
    %c0_i32_0 = arith.constant 0 : i32
    %c0_i32_1 = arith.constant 0 : i32
    %c0_i32_2 = arith.constant 0 : i32
    return %c0_i32, %c0_i32_0, %c0_i32_1 : i32, i32, i32
  }
  func.func @transform_8(%arg0: i32, %arg1: i32) -> (i32, i32) {
    %c0_i32 = arith.constant 0 : i32
    %c0_i32_0 = arith.constant 0 : i32
    %c0_i32_1 = arith.constant 0 : i32
    return %c0_i32, %c0_i32_0 : i32, i32
  }
  func.func @transform_9(%arg0: i32, %arg1: i32) -> (i32, i32) {
    %c0_i32 = arith.constant 0 : i32
    %c0_i32_0 = arith.constant 0 : i32
    %c0_i32_1 = arith.constant 0 : i32
    return %c0_i32, %c0_i32_0 : i32, i32
  }
  func.func @transform_10(%arg0: i32, %arg1: i32) -> (i32, i32) {
    %c0_i32 = arith.constant 0 : i32
    %c0_i32_0 = arith.constant 0 : i32
    %c0_i32_1 = arith.constant 0 : i32
    return %c0_i32, %c0_i32_0 : i32, i32
  }
  func.func @transform_11(%arg0: i32, %arg1: i32) -> (i32, i32) {
    %c0_i32 = arith.constant 0 : i32
    %c0_i32_0 = arith.constant 0 : i32
    %c0_i32_1 = arith.constant 0 : i32
    return %c0_i32, %c0_i32_0 : i32, i32
  }
  func.func @transform_12(%arg0: i32, %arg1: i32) -> (i32, i32) {
    %c0_i32 = arith.constant 0 : i32
    %c0_i32_0 = arith.constant 0 : i32
    %c0_i32_1 = arith.constant 0 : i32
    return %c0_i32, %c0_i32_0 : i32, i32
  }
  func.func @transform_13(%arg0: i32, %arg1: i32) -> (i32, i32) {
    %c0_i32 = arith.constant 0 : i32
    %c0_i32_0 = arith.constant 0 : i32
    %c0_i32_1 = arith.constant 0 : i32
    return %c0_i32, %c0_i32_0 : i32, i32
  }
  func.func @transform_14(%arg0: i32, %arg1: i32) -> (i32, i32) {
    %c0_i32 = arith.constant 0 : i32
    %c0_i32_0 = arith.constant 0 : i32
    %c0_i32_1 = arith.constant 0 : i32
    return %c0_i32, %c0_i32_0 : i32, i32
  }
  func.func @transform_15(%arg0: i32, %arg1: i32) -> (i32, i32, i32) {
    %c0_i32 = arith.constant 0 : i32
    %c0_i32_0 = arith.constant 0 : i32
    return %arg0, %arg1, %c0_i32 : i32, i32, i32
  }
}

</mosaic_0001>

<bundles_post_ra>
// kernel: normalized_transformer_block.1
= control target key start
LH: loop header
LB: loop body
LE: loop exit
PB: predicated region body
PF: predicated region fallthrough
CT: control target
= control target key end

     0   :  { %s3344_s0 = inlined_call_operand.vmem [shape: f32[2,8,32], index: 0, kind: input, shape index: {}]   ;;  %s3345_s1 = inlined_call_operand.vmem [shape: bf16[4,32,8], index: 1, kind: input, shape index: {}]   ;;  %s3346_s2 = inlined_call_operand.vmem [shape: f32[4,1,8], index: 2, kind: input, shape index: {}]   ;;  %s3347_s3 = inlined_call_operand.vmem [shape: bf16[4,32,8], index: 3, kind: input, shape index: {}]   ;;  %s3348_s4 = inlined_call_operand.vmem [shape: f32[4,1,8], index: 4, kind: input, shape index: {}]   ;;  %s3349_s5 = inlined_call_operand.vmem [shape: bf16[4,32,8], index: 5, kind: input, shape index: {}]   ;;  %s3350_s6 = inlined_call_operand.vmem [shape: f32[4,1,8], index: 6, kind: input, shape index: {}]   ;;  %s3351_s7 = inlined_call_operand.vmem [shape: bf16[4,8,32], index: 7, kind: input, shape index: {}]   ;;  %s3352_s8 = inlined_call_operand.vmem [shape: f32[1,32], index: 8, kind: input, shape index: {}]   ;;  %s3353_s9 = inlined_call_operand.vmem [shape: bf16[32,64], index: 9, kind: input, shape index: {}]   ;;  %s3354_s10 = inlined_call_operand.vmem [shape: f32[1,64], index: 10, kind: input, shape index: {}]   ;;  %s3355_s11 = inlined_call_operand.vmem [shape: bf16[64,32], index: 11, kind: input, shape index: {}]   ;;  %s3356_s12 = inlined_call_operand.vmem [shape: f32[1,32], index: 12, kind: input, shape index: {}]   ;;  %s3357_s13 = inlined_call_operand.vmem [shape: f32[1,32], index: 13, kind: input, shape index: {}]   ;;  %s3358_s14 = inlined_call_operand.vmem [shape: f32[1,32], index: 14, kind: input, shape index: {}]   ;;  %s3359_s15 = inlined_call_operand.hbm [shape: f32[2,8,32], index: 15, kind: output, shape index: {}]  }
   0x1   :  { %3363 = sst [smem:[#allocation12_spill]] %s3344_s0 }
   0x2   :  { %3364 = sst [smem:[#allocation13_spill]] %s3345_s1 }
   0x3   :  { %3365 = sst [smem:[#allocation14_spill]] %s3346_s2 }
   0x4   :  { %20 = vsyncpa [#allocation6], 0 }
   0x5   :  { %22 = vsyncpa [#allocation6 + $0x1], 0  ;;  %s2912_s18 = smov 0   ;;  %s2914_s19 = smov 0  }
   0x6   :  { %s2916_s20 = smov 0   ;;  %s2918_s21 = smov 0  }
   0x7   :  { %s2920_s22 = smov 0   ;;  %s2922_s23 = smov 0  }
   0x8 LB: > { %3366 = sst [smem:[#allocation8_spill]] %s2815_s20  ;;  %s2255_s24 = sadd.s32 4294967295, %s2827_s23   ;;  %s2827_s23 = sphi %s2922_s23, %s28_s23   ;;  %s2823_s22 = sphi %s2920_s22, %s3378_s22   ;;  %s2819_s21 = sphi %s2918_s21, %s3377_s21   ;;  %s2815_s20 = sphi %s2916_s20, %s3376_s20   ;;  %s2811_s19 = sphi %s2914_s19, %s3380_s19   ;;  %s2807_s18 = sphi %s2912_s18, %s3379_s18  }
   0x9   : > { %3367 = sst [smem:[#allocation9_spill]] %s2823_s22  ;;  %s2256_s25 = sadd.s32 4294967294, %s2827_s23  }
   0xa   : > { %s40_s26 = sadd.s32 1, %s2823_s22  ;;  %s369_s27 = sadd.s32 1, %s2815_s20 }
   0xb   : > { %p42_p0 = scmp.ge.s32.totalorder %s40_s26, 2  ;;  %p379_p1 = scmp.ne.s32.totalorder %s2815_s20, %s2811_s19 }
   0xc   : > { %p380_p2 = scmp.eq.s32.totalorder %s2255_s24, 1  ;;  %p385_p3 = scmp.ne.s32.totalorder %s2811_s19, %s2807_s18 }
   0xd   : > { %s3382_s26 = smov (%p42_p0, %s40_s26), 0  ;;  %p386_p5 = scmp.eq.s32.totalorder %s2256_s25, 1 }
   0xe   : > { %3368 = sst [smem:[#allocation10_spill]] %s3382_s26  ;;  %p2952_p4 = por %p380_p2, %p379_p1 }
   0xf   : > { %s364_s29 = ssub.s32 %s2823_s22, %s3382_s26  ;;  %p2259_p6 = scmp.ge.s32.totalorder %s2827_s23, 1 }
  0x10   : > { %p367_p7 = scmp.eq.s32.totalorder %s364_s29, 0  ;;  %p2959_p8 = por %p386_p5, %p385_p3 }
  0x11   : > { %p453_p9 = scmp.lt.s32.totalorder %s2827_s23, 3 }
  0x12   : > { %s2965_s16 = scalar_select %p367_p7, %s2815_s20, %s369_s27  }
  0x13   : > { %p454_p10 = pnand %p2259_p6, %p453_p9 }
  0x14   : > { %3371 = sst [smem:[#allocation11_spill]] %s2965_s16  ;;  %p500_p11 = scmp.lt.s32.totalorder (!%p454_p10), %s2819_s21, 1 }
  0x15   : > { %457 = sbr.rel (%p454_p10) target bundleno = 2241 (0x8c1), region = 80  ;;  %s3372_s0 = sld [smem:[#allocation12_spill]] (!%p454_p10) }
  0x16   : > { %s3373_s1 = sld [smem:[#allocation13_spill]] (!%p454_p10)  ;;  %s497_s22 = sand.u32 (!%p454_p10), 1, %s2811_s19  }
  0x17   : > { %s3374_s2 = sld [smem:[#allocation14_spill]] (!%p454_p10)  ;;  %s2260_s16 = sshll.u32 (!%p454_p10), %s497_s22, 3 }
  0x18   : > { %s2171_s24 = scalar_lea.sflag (!%p454_p10), [#allocation6], %s497_s22 }
  0x1a   : > { %v2697_v0 = vld [vmem:[%s3347_s3 + $0x8] sm:$0xff]   ;;  %v2829_v1 = vmov 0.0   ;;  %v2699_v3 = vld [vmem:[%s3347_s3] sm:$0xff]   ;;  %vm2830_vm0 = vmmov 0   ;;  %s501_s25 = scalar_select %p500_p11, %s2819_s21, 1  ;;  %v2701_v5 = vld [vmem:[%s3347_s3 + $0x18] sm:$0xff]  }
  0x1b   : > { %2452 = vmatprep.subr.bf16.mxu0 %v2829_v1  ;;  %2460 = vmatprep.subr.bf16.mxu1 %v2829_v1  ;;  %v2698_v2 = vld [vmem:[%s3349_s5 + $0x8] sm:$0xff]   ;;  %v2700_v4 = vld [vmem:[%s3349_s5] sm:$0xff]   ;;  %v2702_v6 = vld [vmem:[%s3349_s5 + $0x18] sm:$0xff]   ;;  %vm534_vm1 = vcmask 261120   ;;  %vm642_vm2 = vcmask 60416   ;;  %vm1344_vm3 = vcmask 64512  }
  0x1c   : > { %2453 = vmatpush3.bf16.msra.mxu0 %v2697_v0  ;;  %2456 = vmatprep.mubr.msk.bf16.mxu0 %vm2830_vm0, %v2829_v1  ;;  %s2261_s26 = sshll.u32 %s501_s25, 3  ;;  %v2703_v9 = vld [vmem:[%s3347_s3 + $0x10] sm:$0xff]   ;;  %v2705_v11 = vld [vmem:[%s3347_s3 + $0x28] sm:$0xff]   ;;  %v2707_v13 = vld [vmem:[%s3347_s3 + $0x20] sm:$0xff]   ;;  %vm1580_vm4 = vcmask 1043456   ;;  %vm2101_vm5 = vcmask 523264  }
  0x1d   : > { %2461 = vmatpush3.bf16.msra.mxu1 %v2698_v2  ;;  %2454 = vmatprep.subr.bf16.mxu0 %v2829_v1  ;;  %s503_s20 = scalar_lea.vmem %s3372_s0, %s2261_s26  ;;  %v2704_v10 = vld [vmem:[%s3349_s5 + $0x10] sm:$0xff]   ;;  %v2706_v12 = vld [vmem:[%s3349_s5 + $0x28] sm:$0xff]   ;;  %v2708_v14 = vld [vmem:[%s3349_s5 + $0x20] sm:$0xff]   ;;  %s499_s25 = scalar_lea.vmem [#allocation5], %s2260_s16 }
  0x1e   : > { %2462 = vmatprep.subr.bf16.mxu1 %v2829_v1  ;;  %2464 = vmatprep.mubr.msk.bf16.mxu1 %vm2830_vm0, %v2829_v1  ;;  %v2999_v7 = vld [vmem:[%s503_s20] sm:$0xff]  ;;  %v2709_v15 = vld [vmem:[%s3347_s3 + $0x38] sm:$0xff]   ;;  %v2711_v17 = vld [vmem:[%s3347_s3 + $0x30] sm:$0xff]   ;;  %s2381_s20 = sshll.u32 %s2819_s21, 7  ;;  %s2185_s26 = sshll.u32 %s499_s25, 4  ;;  %s2186_s26 = int_to_ptr.vmem [resolvable:$true] %s2185_s26 }
  0x1f   : > { %v3004_v8 = vpack.c.bf16 %v2999_v7, %v2999_v7  ;;  %v2710_v16 = vld [vmem:[%s3349_s5 + $0x38] sm:$0xff]   ;;  %v2712_v18 = vld [vmem:[%s3349_s5 + $0x30] sm:$0xff]   ;;  %v2713_v19 = vld [vmem:[%s3373_s1 + $0x8] sm:$0xff]   ;;  %s2183_s17 = scalar_lea.hbm %s3359_s15, %s2381_s20  ;;  %s2751_s0 = scalar_lea.vmem %s2186_s26, 128 }
  0x20   : > { %2455 = vmatpush3.bf16.msra.mxu0 %v2699_v3  ;;  %v2714_v20 = vld [vmem:[%s3373_s1 + $0x18] sm:$0xff]   ;;  %v2715_v21 = vld [vmem:[%s3373_s1] sm:$0xff]   ;;  %v2716_v22 = vld [vmem:[%s3373_s1 + $0x10] sm:$0xff]   ;;  %p2752_p12 = scmp.ne.s32.totalorder %s2186_s26, %s2751_s0 }
  0x21   : > { %2463 = vmatpush3.bf16.msra.mxu1 %v2700_v4  ;;  %2468 = vmatprep.subr.bf16.mxu0 %v2829_v1  ;;  %v2717_v23 = vld [vmem:[%s3373_s1 + $0x28] sm:$0xff]   ;;  %v2718_v24 = vld [vmem:[%s3373_s1 + $0x38] sm:$0xff]   ;;  %v2719_v25 = vld [vmem:[%s3373_s1 + $0x20] sm:$0xff]  }
  0x22   : > { %2476 = vmatprep.subr.bf16.mxu1 %v2829_v1  ;;  %v2720_v26 = vld [vmem:[%s3373_s1 + $0x30] sm:$0xff]   ;;  %v2262_v27 = vld [vmem:[%s3348_s4] ss:$0 sm:$0xff]  ;;  %v2275_v41 = vld [vmem:[%s3348_s4 + $0x1] ss:$0 sm:$0xff]  ;;  %p2753_p13 = pnand %p2752_p12, %p2952_p4  ;;  %s2831_s1 = smov [#allocation5]  }
  0x23   : > { %2457 = vmatmul.mubr.msk.bf16.vlgmr.msra.gmra.mxu0 %vm534_vm1, %v3004_v8  ;;  %v2266_v28 = vld [vmem:[%s3350_s6] ss:$0 sm:$0xff]  ;;  %v2284_v42 = vld [vmem:[%s3350_s6 + $0x1] ss:$0 sm:$0xff]  ;;  %v2293_v57 = vld [vmem:[%s3348_s4 + $0x2] ss:$0 sm:$0xff] }
  0x24   : > { %2465 = vmatmul.mubr.msk.bf16.vlgmr.msra.gmra.mxu1 %vm534_vm1, %v3004_v8  ;;  %2469 = vmatpush3.bf16.msra.mxu0 %v2701_v5  ;;  %v2302_v58 = vld [vmem:[%s3350_s6 + $0x2] ss:$0 sm:$0xff]  ;;  %p2754_p0 = pneg %p2753_p13 }
  0x25   : > { %2477 = vmatpush3.bf16.msra.mxu1 %v2702_v6  ;;  %2470 = vmatprep.subr.bf16.mxu0 %v2829_v1 }
  0x26   : > { %2478 = vmatprep.subr.bf16.mxu1 %v2829_v1  ;;  %2472 = vmatprep.mubr.msk.bf16.mxu0 %vm2830_vm0, %v2829_v1 }
  0x27   : > { %2480 = vmatprep.mubr.msk.bf16.mxu1 %vm2830_vm0, %v2829_v1 }
  0x28   : > { %2471 = vmatpush3.bf16.msra.mxu0 %v2703_v9 }
  0x29   : > { %2479 = vmatpush3.bf16.msra.mxu1 %v2704_v10  ;;  %2484 = vmatprep.subr.bf16.mxu0 %v2829_v1 }
  0x2a   : > { %2492 = vmatprep.subr.bf16.mxu1 %v2829_v1 }
  0x2b   : > { %2473 = vmatmul.mubr.msk.bf16.vlgmr.msra.gmra.mxu0 %vm534_vm1, %v3004_v8 }
  0x2c   : > { %2481 = vmatmul.mubr.msk.bf16.vlgmr.msra.gmra.mxu1 %vm534_vm1, %v3004_v8  ;;  %2485 = vmatpush3.bf16.msra.mxu0 %v2705_v11  ;;  %v2311_v11 = vld [vmem:[%s3348_s4 + $0x3] ss:$0 sm:$0xff] }
  0x2d   : > { %2493 = vmatpush3.bf16.msra.mxu1 %v2706_v12  ;;  %2486 = vmatprep.subr.bf16.mxu0 %v2829_v1  ;;  %v2320_v12 = vld [vmem:[%s3350_s6 + $0x3] ss:$0 sm:$0xff] }
  0x2e   : > { %2494 = vmatprep.subr.bf16.mxu1 %v2829_v1  ;;  %2488 = vmatprep.mubr.msk.bf16.mxu0 %vm2830_vm0, %v2829_v1 }
  0x2f   : > { %2496 = vmatprep.mubr.msk.bf16.mxu1 %vm2830_vm0, %v2829_v1 }
  0x30   : > { %2487 = vmatpush3.bf16.msra.mxu0 %v2707_v13 }
  0x31   : > { %2495 = vmatpush3.bf16.msra.mxu1 %v2708_v14  ;;  %2500 = vmatprep.subr.bf16.mxu0 %v2829_v1 }
  0x32   : > { %2508 = vmatprep.subr.bf16.mxu1 %v2829_v1 }
  0x33   : > { %2489 = vmatmul.mubr.msk.bf16.vlgmr.msra.gmra.mxu0 %vm534_vm1, %v3004_v8 }
  0x34   : > { %2497 = vmatmul.mubr.msk.bf16.vlgmr.msra.gmra.mxu1 %vm534_vm1, %v3004_v8  ;;  %2501 = vmatpush3.bf16.msra.mxu0 %v2709_v15 }
  0x35   : > { %2509 = vmatpush3.bf16.msra.mxu1 %v2710_v16  ;;  %2502 = vmatprep.subr.bf16.mxu0 %v2829_v1 }
  0x36   : > { %2510 = vmatprep.subr.bf16.mxu1 %v2829_v1  ;;  %2504 = vmatprep.mubr.msk.bf16.mxu0 %vm2830_vm0, %v2829_v1 }
  0x37   : > { %2512 = vmatprep.mubr.msk.bf16.mxu1 %vm2830_vm0, %v2829_v1 }
  0x38   : > { %2503 = vmatpush3.bf16.msra.mxu0 %v2711_v17 }
  0x39   : > { %2511 = vmatpush3.bf16.msra.mxu1 %v2712_v18  ;;  %2516 = vmatprep.subr.bf16.mxu0 %v2829_v1 }
  0x3a   : > { %2524 = vmatprep.subr.bf16.mxu1 %v2829_v1 }
  0x3b   : > { %2505 = vmatmul.mubr.msk.bf16.vlgmr.msra.gmra.mxu0 %vm534_vm1, %v3004_v8 }
  0x3c   : > { %2513 = vmatmul.mubr.msk.bf16.vlgmr.msra.gmra.mxu1 %vm534_vm1, %v3004_v8  ;;  %2517 = vmatpush3.bf16.msra.mxu0 %v2713_v19 }
  0x3d   : > { %2525 = vmatpush3.bf16.msra.mxu1 %v2714_v20  ;;  %2518 = vmatprep.subr.bf16.mxu0 %v2829_v1 }
  0x3e   : > { %2526 = vmatprep.subr.bf16.mxu1 %v2829_v1  ;;  %2520 = vmatprep.mubr.msk.bf16.mxu0 %vm2830_vm0, %v2829_v1 }
  0x3f   : > { %2528 = vmatprep.mubr.msk.bf16.mxu1 %vm2830_vm0, %v2829_v1 }
  0x40   : > { %2519 = vmatpush3.bf16.msra.mxu0 %v2715_v21 }
  0x41   : > { %2527 = vmatpush3.bf16.msra.mxu1 %v2716_v22  ;;  %2532 = vmatprep.subr.bf16.mxu0 %v2829_v1 }
  0x42   : > { %2540 = vmatprep.subr.bf16.mxu1 %v2829_v1 }
  0x43   : > { %2521 = vmatmul.mubr.msk.bf16.vlgmr.msra.gmra.mxu0 %vm534_vm1, %v3004_v8 }
  0x44   : > { %2529 = vmatmul.mubr.msk.bf16.vlgmr.msra.gmra.mxu1 %vm534_vm1, %v3004_v8  ;;  %2533 = vmatpush3.bf16.msra.mxu0 %v2717_v23 }
  0x45   : > { %2541 = vmatpush3.bf16.msra.mxu1 %v2718_v24  ;;  %2534 = vmatprep.subr.bf16.mxu0 %v2829_v1 }
  0x46   : > { %2542 = vmatprep.subr.bf16.mxu1 %v2829_v1  ;;  %2536 = vmatprep.mubr.msk.bf16.mxu0 %vm2830_vm0, %v2829_v1 }
  0x47   : > { %2544 = vmatprep.mubr.msk.bf16.mxu1 %vm2830_vm0, %v2829_v1 }
  0x48   : > { %2535 = vmatpush3.bf16.msra.mxu0 %v2719_v25  ;;  %v2324_v25 = vld [vmem:[%s3374_s2] ss:$0 sm:$0xff] }
  0x49   : > { %2543 = vmatpush3.bf16.msra.mxu1 %v2720_v26  ;;  %2548 = vmatprep.subr.bf16.mxu0 %v2829_v1  ;;  %v2333_v26 = vld [vmem:[%s3374_s2 + $0x1] ss:$0 sm:$0xff] }
  0x4a   : > { %2554 = vmatprep.subr.bf16.mxu1 %v2829_v1 }
  0x4b   : > { %2537 = vmatmul.mubr.msk.bf16.vlgmr.msra.gmra.mxu0 %vm534_vm1, %v3004_v8 }
  0x4c   : > { %2545 = vmatmul.mubr.msk.bf16.vlgmr.msra.gmra.mxu1 %vm534_vm1, %v3004_v8  ;;  %2550 = vmatprep.mubr.msk.bf16.mxu0 %vm2830_vm0, %v2829_v1 }
  0x4d   : > { %2556 = vmatprep.mubr.msk.bf16.mxu1 %vm2830_vm0, %v2829_v1 }
  0xe3   : > { %v572_v29 = vpop.f32.mrf.mxu0 }
  0xe4   : > { %v635_v30 = vpop.f32.mrf.mxu1  ;;  %v573_v31 = vadd.f32 %v2262_v27, %v572_v29 }
  0xe5   : > { %v636_v32 = vadd.f32 %v2266_v28, %v635_v30  ;;  %v2458_v33 = vpop.f32.mrf.mxu0 }
  0xe6   : > { %v2466_v34 = vpop.f32.mrf.mxu1  ;;  %v641_v35 = vpack.c.bf16 %v573_v31, %v573_v31 }
  0xe7   : > { %v644_v36 = vpack.c.bf16 %v636_v32, %v636_v32  ;;  %v575_v37 = vpop.f32.mrf.mxu0 }
  0xe8   : > { %v638_v38 = vpop.f32.mrf.mxu1  ;;  %643 = vst.msk [vmem:[#allocation2] sm:$0xf] %vm642_vm2, %v641_v35 }
  0xe9   : > { %645 = vst.msk [vmem:[#allocation3] sm:$0xf] %vm642_vm2, %v644_v36  ;;  %v2459_v39 = vpop.f32.mrf.mxu0 }
  0xea   : > { %v2467_v40 = vpop.f32.mrf.mxu1  ;;  %v2342_v39 = vld [vmem:[%s3374_s2 + $0x2] ss:$0 sm:$0xff] }
  0xeb   : > { %v705_v43 = vpop.f32.mrf.mxu0  ;;  %v2351_v40 = vld [vmem:[%s3374_s2 + $0x3] ss:$0 sm:$0xff]  ;;  %s2755_s2 = sshll.u32 %s2831_s1, 4  ;;  %s2756_s2 = int_to_ptr.vmem [resolvable:$false] %s2755_s2 }
  0xec   : > { %v770_v44 = vpop.f32.mrf.mxu1  ;;  %v706_v45 = vadd.f32 %v2275_v41, %v705_v43  ;;  %s2757_s21 = scalar_lea.vmem %s2756_s2, 256  ;;  %p2758_p1 = scmp.lt.s32.totalorder %s2186_s26, %s2756_s2 }
  0xed   : > { %v771_v46 = vadd.f32 %v2284_v42, %v770_v44  ;;  %v2474_v47 = vpop.f32.mrf.mxu0  ;;  %p2759_p2 = scmp.lt.s32.totalorder %s2757_s21, %s2751_s0 }
  0xee   : > { %v2482_v48 = vpop.f32.mrf.mxu1  ;;  %v776_v49 = vpack.c.bf16 %v706_v45, %v706_v45 }
  0xef   : > { %v779_v50 = vpack.c.bf16 %v771_v46, %v771_v46  ;;  %v708_v51 = vpop.f32.mrf.mxu0  ;;  %v1336_v53 = vld [vmem:[#allocation2] sm:$0xf]  ;;  %p2760_p3 = por %p2759_p2, %p2758_p1 }
  0xf0   : > { %v773_v52 = vpop.f32.mrf.mxu1  ;;  %778 = vst.msk [vmem:[#allocation2 + $0x4] sm:$0xf] %vm642_vm2, %v776_v49  ;;  %v1349_v54 = vsel %vm1344_vm3, %v1336_v53, 0 }
  0xf1   : > { %781 = vst.msk [vmem:[#allocation3 + $0x4] sm:$0xf] %vm642_vm2, %v779_v50  ;;  %v2475_v55 = vpop.f32.mrf.mxu0  ;;  %2549 = vmatpush3.bf16.xpose.msra.mxu0 %v1349_v54  ;;  %p2761_p5 = pnand %p2760_p3, %p2754_p0 }
  0xf2   : > { %v2483_v56 = vpop.f32.mrf.mxu1  ;;  %2560 = vmatprep.subr.bf16.mxu0 %v2829_v1 }
  0xf3   : > { %v841_v59 = vpop.f32.mrf.mxu0 }
  0xf4   : > { %v906_v60 = vpop.f32.mrf.mxu1  ;;  %v842_v61 = vadd.f32 %v2293_v57, %v841_v59  ;;  %v1340_v59 = vld [vmem:[#allocation3] sm:$0xf] }
  0xf5   : > { %v907_v62 = vadd.f32 %v2302_v58, %v906_v60  ;;  %v2490_v63 = vpop.f32.mrf.mxu0 }
  0xf6   : > { %v2498_v0 = vpop.f32.mrf.mxu1  ;;  %v912_v2 = vpack.c.bf16 %v842_v61, %v842_v61  ;;  %v1582_v63 = vsel %vm1580_vm4, %v1340_v59, 0 }
  0xf7   : > { %v915_v3 = vpack.c.bf16 %v907_v62, %v907_v62  ;;  %v844_v4 = vpop.f32.mrf.mxu0  ;;  %v1337_v6 = vld [vmem:[#allocation2 + $0x4] sm:$0xf] }
  0xf8   : > { %v909_v5 = vpop.f32.mrf.mxu1  ;;  %914 = vst.msk [vmem:[#allocation2 + $0x8] sm:$0xf] %vm642_vm2, %v912_v2  ;;  %v1395_v8 = vsel %vm1344_vm3, %v1337_v6, 0  ;;  %v1341_v60 = vld [vmem:[#allocation3 + $0x4] sm:$0xf] }
  0xf9   : > { %917 = vst.msk [vmem:[#allocation3 + $0x8] sm:$0xf] %vm642_vm2, %v915_v3  ;;  %v2491_v9 = vpop.f32.mrf.mxu0  ;;  %2555 = vmatpush3.bf16.xpose.msra.mxu1 %v1395_v8  ;;  %v1628_v0 = vsel %vm1580_vm4, %v1341_v60, 0 }
  0xfa   : > { %v2499_v10 = vpop.f32.mrf.mxu1  ;;  %2566 = vmatprep.subr.bf16.mxu1 %v2829_v1 }
  0xfb   : > { %v977_v13 = vpop.f32.mrf.mxu0 }
  0xfc   : > { %v1042_v14 = vpop.f32.mrf.mxu1  ;;  %v978_v15 = vadd.f32 %v2311_v11, %v977_v13 }
  0xfd   : > { %v1043_v16 = vadd.f32 %v2320_v12, %v1042_v14  ;;  %v2506_v17 = vpop.f32.mrf.mxu0 }
  0xfe   : > { %v2514_v18 = vpop.f32.mrf.mxu1  ;;  %v1048_v19 = vpack.c.bf16 %v978_v15, %v978_v15 }
  0xff   : > { %v1051_v20 = vpack.c.bf16 %v1043_v16, %v1043_v16  ;;  %v980_v21 = vpop.f32.mrf.mxu0  ;;  %v1338_v47 = vld [vmem:[#allocation2 + $0x8] sm:$0xf] }
 0x100   : > { %v1045_v22 = vpop.f32.mrf.mxu1  ;;  %1050 = vst.msk [vmem:[#allocation2 + $0xc] sm:$0xf] %vm642_vm2, %v1048_v19  ;;  %v1441_v55 = vsel %vm1344_vm3, %v1338_v47, 0 }
 0x101   : > { %1053 = vst.msk [vmem:[#allocation3 + $0xc] sm:$0xf] %vm642_vm2, %v1051_v20  ;;  %v2507_v23 = vpop.f32.mrf.mxu0 }
 0x102   : > { %v2515_v24 = vpop.f32.mrf.mxu1 }
 0x103   : > { %v1119_v27 = vpop.f32.mrf.mxu0 }
 0x104   : > { %v1187_v28 = vpop.f32.mrf.mxu1  ;;  %v1120_v29 = vadd.f32 %v2324_v25, %v1119_v27 }
 0x105   : > { %v1188_v30 = vadd.f32 %v2333_v26, %v1187_v28  ;;  %v2522_v31 = vpop.f32.mrf.mxu0 }
 0x106   : > { %v2530_v32 = vpop.f32.mrf.mxu1  ;;  %v1125_v33 = vpack.c.bf16 %v1120_v29, %v1120_v29 }
 0x107   : > { %v1193_v34 = vpack.c.bf16 %v1188_v30, %v1188_v30  ;;  %v1122_v35 = vpop.f32.mrf.mxu0  ;;  %v1339_v48 = vld [vmem:[#allocation2 + $0xc] sm:$0xf] }
 0x108   : > { %v1190_v36 = vpop.f32.mrf.mxu1  ;;  %1127 = vst.msk [vmem:[#allocation4] sm:$0xf] %vm642_vm2, %v1125_v33  ;;  %v1487_v56 = vsel %vm1344_vm3, %v1339_v48, 0 }
 0x109   : > { %1195 = vst.msk [vmem:[#allocation4 + $0x4] sm:$0xf] %vm642_vm2, %v1193_v34  ;;  %v2523_v37 = vpop.f32.mrf.mxu0 }
 0x10a   : > { %v2531_v38 = vpop.f32.mrf.mxu1 }
 0x10b   : > { %v1255_v41 = vpop.f32.mrf.mxu0 }
 0x10c   : > { %v1323_v42 = vpop.f32.mrf.mxu1  ;;  %v1256_v43 = vadd.f32 %v2342_v39, %v1255_v41 }
 0x10d   : > { %v1324_v44 = vadd.f32 %v2351_v40, %v1323_v42  ;;  %v2538_v45 = vpop.f32.mrf.mxu0 }
 0x10e   : > { %v2546_v46 = vpop.f32.mrf.mxu1  ;;  %v1261_v49 = vpack.c.bf16 %v1256_v43, %v1256_v43 }
 0x10f   : > { %v1329_v50 = vpack.c.bf16 %v1324_v44, %v1324_v44  ;;  %v1258_v51 = vpop.f32.mrf.mxu0  ;;  %v1332_v53 = vld [vmem:[#allocation4] sm:$0xf] }
 0x110   : > { %v1326_v52 = vpop.f32.mrf.mxu1  ;;  %v1333_v54 = vld [vmem:[#allocation4 + $0x4] sm:$0xf]  ;;  %1263 = vst.msk [vmem:[#allocation4 + $0x8] sm:$0xf] %vm642_vm2, %v1261_v49  ;;  %2551 = vmatmul.mubr.msk.bf16.vlgmr.msra.gmra.mxu0 %vm1344_vm3, %v1332_v53  ;;  %v1342_v49 = vld [vmem:[#allocation3 + $0x8] sm:$0xf] }
 0x111   : > { %1331 = vst.msk [vmem:[#allocation4 + $0xc] sm:$0xf] %vm642_vm2, %v1329_v50  ;;  %2557 = vmatmul.mubr.msk.bf16.vlgmr.msra.gmra.mxu1 %vm1344_vm3, %v1333_v54  ;;  %2561 = vmatpush3.bf16.xpose.msra.mxu0 %v1441_v55  ;;  %v2539_v57 = vpop.f32.mrf.mxu0  ;;  %v1674_v52 = vsel %vm1580_vm4, %v1342_v49, 0  ;;  %v1343_v54 = vld [vmem:[#allocation3 + $0xc] sm:$0xf] }
 0x112   : > { %2567 = vmatpush3.bf16.xpose.msra.mxu1 %v1487_v56  ;;  %v2547_v58 = vpop.f32.mrf.mxu1  ;;  %2562 = vmatprep.mubr.msk.bf16.mxu0 %vm2830_vm0, %v2829_v1  ;;  %v1766_v57 = vld [vmem:[%s3351_s7] sm:$0xf] }
 0x113   : > { %2568 = vmatprep.mubr.msk.bf16.mxu1 %vm2830_vm0, %v2829_v1  ;;  %2572 = vmatprep.subr.bf16.mxu0 %v2829_v1  ;;  %v1720_v58 = vsel %vm1580_vm4, %v1343_v54, 0 }
 0x114   : > { %2578 = vmatprep.subr.bf16.mxu1 %v2829_v1 }
 0x117   : > { %v1334_v61 = vld [vmem:[#allocation4 + $0x8] sm:$0xf] }
 0x118   : > { %v1335_v62 = vld [vmem:[#allocation4 + $0xc] sm:$0xf]  ;;  %2563 = vmatmul.mubr.msk.bf16.vlgmr.msra.gmra.mxu0 %vm1344_vm3, %v1334_v61  ;;  %v1774_v61 = vsel %vm1580_vm4, %v1766_v57, 0 }
 0x119   : > { %2569 = vmatmul.mubr.msk.bf16.vlgmr.msra.gmra.mxu1 %vm1344_vm3, %v1335_v62  ;;  %2573 = vmatpush3.bf16.msra.mxu0 %v1582_v63 }
 0x11a   : > { %2579 = vmatpush3.bf16.msra.mxu1 %v1628_v0  ;;  %2574 = vmatprep.mubr.msk.bf16.mxu0 %vm2830_vm0, %v2829_v1 }
 0x11b   : > { %2584 = vmatprep.subr.bf16.mxu0 %v2829_v1  ;;  %2580 = vmatprep.mubr.msk.bf16.mxu1 %vm2830_vm0, %v2829_v1 }
 0x11c   : > { %2590 = vmatprep.subr.bf16.mxu1 %v2829_v1 }
 0x1d0   : > { %v1385_v2 = vpop.f32.mrf.mxu0 }
 0x1d1   : > { %v1431_v3 = vpop.f32.mrf.mxu1  ;;  %v1529_v4 = vsel %vm1344_vm3, %v1385_v2, -inf }
 0x1d2   : > { %1530 = vmax.xlane.f32.xlu0 %v1529_v4  ;;  %v2552_v6 = vpop.f32.mrf.mxu0  ;;  %v1532_v8 = vsel %vm1344_vm3, %v1431_v3, -inf  ;;  %v1768_v4 = vld [vmem:[%s3351_s7 + $0x8] sm:$0xf] }
 0x1d3   : > { %v2558_v5 = vpop.f32.mrf.mxu1 }
 0x1d4   : > { %v1388_v9 = vpop.f32.mrf.mxu0 }
 0x1d5   : > { %v1434_v10 = vpop.f32.mrf.mxu1 }
 0x1d6   : > { %1533 = vmax.xlane.f32.xlu0 %v1532_v8  ;;  %v2553_v12 = vpop.f32.mrf.mxu0  ;;  %v1866_v8 = vsel %vm1580_vm4, %v1768_v4, 0  ;;  %v1769_v10 = vld [vmem:[%s3351_s7 + $0xc] sm:$0xf]  ;;  %v2722_v4 = vld [vmem:[%s3353_s9] sm:$0xff]  }
 0x1d7   : > { %v2559_v11 = vpop.f32.mrf.mxu1 }
 0x1d8   : > { %v1477_v13 = vpop.f32.mrf.mxu0 }
 0x1d9   : > { %v1523_v14 = vpop.f32.mrf.mxu1  ;;  %v1535_v15 = vsel %vm1344_vm3, %v1477_v13, -inf }
 0x1da   : > { %1536 = vmax.xlane.f32.xlu1 %v1535_v15  ;;  %v2564_v17 = vpop.f32.mrf.mxu0  ;;  %v1538_v18 = vsel %vm1344_vm3, %v1523_v14, -inf }
 0x1db   : > { %v2570_v16 = vpop.f32.mrf.mxu1 }
 0x1dc   : > { %v1480_v19 = vpop.f32.mrf.mxu0 }
 0x1dd   : > { %v1526_v20 = vpop.f32.mrf.mxu1 }
 0x1de   : > { %1539 = vmax.xlane.f32.xlu1 %v1538_v18  ;;  %v2565_v22 = vpop.f32.mrf.mxu0 }
 0x1df   : > { %v2571_v21 = vpop.f32.mrf.mxu1 }
 0x25b   : > { %v1531_v23 = vpop.xlane.xlu0 %1530 }
 0x25c   : > { %v1541_v24 = vsub.f32 %v1385_v2, %v1531_v23  ;;  %v1767_v2 = vld [vmem:[%s3351_s7 + $0x4] sm:$0xf] }
 0x25e   : > { %v1545_v25 = vmul.f32 1.442695, %v1541_v24 }
 0x25f   : > { %v1534_v26 = vpop.xlane.xlu0 %1533 }
 0x260   : > { %2727 = vpow2.f32 %v1545_v25  ;;  %v1542_v27 = vsub.f32 %v1431_v3, %v1534_v26  ;;  %v1820_v3 = vsel %vm1580_vm4, %v1767_v2, 0 }
 0x262   : > { %v1547_v28 = vmul.f32 1.442695, %v1542_v27 }
 0x263   : > { %v1537_v29 = vpop.xlane.xlu1 %1536 }
 0x264   : > { %2729 = vpow2.f32 %v1547_v28  ;;  %v1543_v30 = vsub.f32 %v1477_v13, %v1537_v29 }
 0x266   : > { %v1549_v31 = vmul.f32 1.442695, %v1543_v30 }
 0x267   : > { %v1540_v32 = vpop.xlane.xlu1 %1539 }
 0x268   : > { %2731 = vpow2.f32 %v1549_v31  ;;  %v1544_v33 = vsub.f32 %v1523_v14, %v1540_v32  ;;  %v1912_v14 = vsel %vm1580_vm4, %v1769_v10, 0 }
 0x26a   : > { %v1551_v34 = vmul.f32 1.442695, %v1544_v33 }
 0x26c   : > { %2733 = vpow2.f32 %v1551_v34 }
 0x26d   : > { %v2728_v35 = vpop.eup %2727 }
 0x26e   : > { %v1553_v36 = vsel %vm1344_vm3, %v2728_v35, 0.0 }
 0x26f   : > { %1554 = vadd.xlane.f32.xlu0 %v1553_v36 }
 0x271   : > { %v2730_v37 = vpop.eup %2729 }
 0x272   : > { %v1556_v38 = vsel %vm1344_vm3, %v2730_v37, 0.0 }
 0x273   : > { %1557 = vadd.xlane.f32.xlu1 %v1556_v38 }
 0x275   : > { %v2732_v39 = vpop.eup %2731 }
 0x276   : > { %v1559_v40 = vsel %vm1344_vm3, %v2732_v39, 0.0 }
 0x277   : > { %1560 = vadd.xlane.f32.xlu0 %v1559_v40 }
 0x279   : > { %v2734_v41 = vpop.eup %2733 }
 0x27a   : > { %v1562_v42 = vsel %vm1344_vm3, %v2734_v41, 0.0 }
 0x27b   : > { %1563 = vadd.xlane.f32.xlu1 %v1562_v42 }
 0x2f8   : > { %v1555_v43 = vpop.xlane.xlu0 %1554 }
 0x2f9   : > { %2735 = vrcp.f32 %v1555_v43 }
 0x2fc   : > { %v1558_v44 = vpop.xlane.xlu1 %1557 }
 0x2fd   : > { %2737 = vrcp.f32 %v1558_v44 }
 0x300   : > { %v1561_v45 = vpop.xlane.xlu0 %1560 }
 0x301   : > { %2739 = vrcp.f32 %v1561_v45 }
 0x304   : > { %v1564_v46 = vpop.xlane.xlu1 %1563 }
 0x305   : > { %2741 = vrcp.f32 %v1564_v46 }
 0x306   : > { %v2736_v47 = vpop.eup %2735 }
 0x307   : > { %v1569_v48 = vmul.f32 %v2736_v47, %v2728_v35  ;;  %v2367_v47 = vld [vmem:[%s3352_s8] ss:$0 sm:$0xff] }
 0x309   : > { %v1573_v50 = vpack.c.bf16 %v1569_v48, %v1569_v48 }
 0x30a   : > { %v2738_v51 = vpop.eup %2737 }
 0x30b   : > { %2575 = vmatmul.mubr.msk.bf16.vlgmr.msra.gmra.mxu0 %vm1344_vm3, %v1573_v50  ;;  %v1570_v53 = vmul.f32 %v2738_v51, %v2730_v37 }
 0x30c   : > { %2585 = vmatpush3.bf16.msra.mxu0 %v1674_v52  ;;  %2586 = vmatprep.mubr.msk.bf16.mxu0 %vm2830_vm0, %v2829_v1 }
 0x30d   : > { %v1574_v55 = vpack.c.bf16 %v1570_v53, %v1570_v53  ;;  %2596 = vmatprep.subr.bf16.mxu0 %v2829_v1 }
 0x30e   : > { %v2740_v56 = vpop.eup %2739 }
 0x30f   : > { %2581 = vmatmul.mubr.msk.bf16.vlgmr.msra.gmra.mxu1 %vm1344_vm3, %v1574_v55  ;;  %v1571_v59 = vmul.f32 %v2740_v56, %v2732_v39 }
 0x310   : > { %2591 = vmatpush3.bf16.msra.mxu1 %v1720_v58  ;;  %2592 = vmatprep.mubr.msk.bf16.mxu1 %vm2830_vm0, %v2829_v1 }
 0x311   : > { %v1575_v60 = vpack.c.bf16 %v1571_v59, %v1571_v59  ;;  %2602 = vmatprep.subr.bf16.mxu1 %v2829_v1 }
 0x312   : > { %v2742_v62 = vpop.eup %2741 }
 0x313   : > { %2587 = vmatmul.mubr.msk.bf16.vlgmr.msra.gmra.mxu0 %vm1344_vm3, %v1575_v60  ;;  %v1572_v63 = vmul.f32 %v2742_v62, %v2734_v41  ;;  %v2368_v60 = vld [vmem:[%s3357_s13] ss:$0 sm:$0xff] }
 0x314   : > { %2597 = vmatpush3.bf16.msra.mxu0 %v1774_v61  ;;  %2598 = vmatprep.mubr.msk.bf16.mxu0 %vm2830_vm0, %v2829_v1 }
 0x315   : > { %v1576_v0 = vpack.c.bf16 %v1572_v63, %v1572_v63  ;;  %2608 = vmatprep.subr.bf16.mxu0 %v2829_v1 }
 0x317   : > { %2593 = vmatmul.mubr.msk.bf16.vlgmr.msra.gmra.mxu1 %vm1344_vm3, %v1576_v0 }
 0x318   : > { %2604 = vmatprep.mubr.msk.bf16.mxu1 %vm2830_vm0, %v2829_v1  ;;  %2603 = vmatpush3.bf16.msra.mxu1 %v1820_v3  ;;  %v2721_v3 = vld [vmem:[%s3353_s9 + $0x8] sm:$0xff]  }
 0x319   : > { %2614 = vmatprep.subr.bf16.mxu1 %v2829_v1 }
 0x3cb   : > { %v1618_v5 = vpop.f32.mrf.mxu0 }
 0x3cc   : > { %v1762_v6 = vpack.c.bf16 %v1618_v5, %v1618_v5  ;;  %v2724_v5 = vld [vmem:[%s3355_s11 + $0x10] sm:$0xff]  }
 0x3cd   : > { %v2576_v9 = vpop.f32.mrf.mxu0 }
 0x3ce   : > { %2599 = vmatmul.mubr.msk.bf16.vlgmr.msra.gmra.mxu0 %vm1344_vm3, %v1762_v6 }
 0x3cf   : > { %v1621_v11 = vpop.f32.mrf.mxu0  ;;  %v1664_v12 = vpop.f32.mrf.mxu1  ;;  %2609 = vmatpush3.bf16.msra.mxu0 %v1866_v8  ;;  %2610 = vmatprep.mubr.msk.bf16.mxu0 %vm2830_vm0, %v2829_v1 }
 0x3d0   : > { %v1763_v13 = vpack.c.bf16 %v1664_v12, %v1664_v12  ;;  %2620 = vmatprep.subr.bf16.mxu0 %v2829_v1  ;;  %v2725_v12 = vld [vmem:[%s3355_s11 + $0x8] sm:$0xff]  }
 0x3d1   : > { %v2577_v15 = vpop.f32.mrf.mxu0  ;;  %v2582_v16 = vpop.f32.mrf.mxu1 }
 0x3d2   : > { %2605 = vmatmul.mubr.msk.bf16.vlgmr.msra.gmra.mxu1 %vm1344_vm3, %v1763_v13  ;;  %v2726_v13 = vld [vmem:[%s3355_s11] sm:$0xff]  }
 0x3d3   : > { %v1667_v17 = vpop.f32.mrf.mxu1  ;;  %v1710_v18 = vpop.f32.mrf.mxu0  ;;  %2615 = vmatpush3.bf16.msra.mxu1 %v1912_v14  ;;  %2616 = vmatprep.mubr.msk.bf16.mxu1 %vm2830_vm0, %v2829_v1  ;;  %v2369_v14 = vld [vmem:[%s3354_s10] ss:$0 sm:$0xff] }
 0x3d4   : > { %v1764_v19 = vpack.c.bf16 %v1710_v18, %v1710_v18  ;;  %2628 = vmatprep.subr.bf16.mxu1 %v2829_v1 }
 0x3d5   : > { %v2583_v20 = vpop.f32.mrf.mxu1  ;;  %v2588_v21 = vpop.f32.mrf.mxu0 }
 0x3d6   : > { %2611 = vmatmul.mubr.msk.bf16.vlgmr.msra.gmra.mxu0 %vm1344_vm3, %v1764_v19 }
 0x3d7   : > { %v1713_v22 = vpop.f32.mrf.mxu0  ;;  %v1756_v23 = vpop.f32.mrf.mxu1  ;;  %2624 = vmatprep.mubr.msk.bf16.mxu0 %vm2830_vm0, %v2829_v1  ;;  %2621 = vmatpush3.bf16.msra.mxu0 %v2721_v3 }
 0x3d8   : > { %v1765_v24 = vpack.c.bf16 %v1756_v23, %v1756_v23  ;;  %2622 = vmatprep.subr.bf16.mxu0 %v2829_v1 }
 0x3d9   : > { %v2589_v25 = vpop.f32.mrf.mxu0  ;;  %v2594_v26 = vpop.f32.mrf.mxu1 }
 0x3da   : > { %2617 = vmatmul.mubr.msk.bf16.vlgmr.msra.gmra.mxu1 %vm1344_vm3, %v1765_v24 }
 0x3db   : > { %v1759_v27 = vpop.f32.mrf.mxu1  ;;  %2636 = vmatprep.mubr.msk.bf16.mxu1 %vm2830_vm0, %v2829_v1  ;;  %2623 = vmatpush3.bf16.msra.mxu0 %v2722_v4 }
 0x3dd   : > { %v2595_v28 = vpop.f32.mrf.mxu1 }
 0x48e   : > { %v1810_v29 = vpop.f32.mrf.mxu0 }
 0x48f   : > { %v1954_v38 = vsel %vm534_vm1, %v1810_v29, 0.0 }
 0x490   : > { %v2600_v30 = vpop.f32.mrf.mxu0 }
 0x492   : > { %v1813_v31 = vpop.f32.mrf.mxu0  ;;  %v1856_v32 = vpop.f32.mrf.mxu1 }
 0x493   : > { %v1955_v35 = vsel %vm534_vm1, %v1856_v32, 0.0 }
 0x494   : > { %v2601_v33 = vpop.f32.mrf.mxu0  ;;  %v2606_v34 = vpop.f32.mrf.mxu1  ;;  %v1956_v40 = vadd.f32 %v1955_v35, %v1954_v38 }
 0x495   : > { %v2379_v33 = vld [vmem:[%s3358_s14] ss:$0 sm:$0xff] }
 0x496   : > { %v1859_v36 = vpop.f32.mrf.mxu1  ;;  %v1902_v37 = vpop.f32.mrf.mxu0 }
 0x497   : > { %v1957_v39 = vsel %vm534_vm1, %v1902_v37, 0.0 }
 0x498   : > { %v2607_v41 = vpop.f32.mrf.mxu1  ;;  %v2612_v42 = vpop.f32.mrf.mxu0  ;;  %v1958_v43 = vadd.f32 %v1957_v39, %v1956_v40 }
 0x49a   : > { %v1905_v44 = vpop.f32.mrf.mxu0  ;;  %v1948_v45 = vpop.f32.mrf.mxu1 }
 0x49b   : > { %v1959_v46 = vsel %vm534_vm1, %v1948_v45, 0.0 }
 0x49c   : > { %v1960_v48 = vadd.f32 %v1959_v46, %v1958_v43  ;;  %v2613_v49 = vpop.f32.mrf.mxu0  ;;  %v2618_v50 = vpop.f32.mrf.mxu1 }
 0x49e   : > { %v1968_v51 = vadd.f32 %v2367_v47, %v1960_v48  ;;  %v1951_v52 = vpop.f32.mrf.mxu1 }
 0x4a0   : > { %v2619_v53 = vpop.f32.mrf.mxu1  ;;  %v1969_v54 = vmul.f32 %v1968_v51, %v1968_v51 }
 0x4a2   : > { %v1970_v55 = vsel %vm534_vm1, %v1969_v54, 0.0 }
 0x4a3   : > { %1971 = vadd.xlane.f32.xlu0 %v1970_v55 }
 0x52c   : > { %v1972_v56 = vpop.xlane.xlu0 %1971 }
 0x52d   : > { %v1973_v57 = vmax.f32 %v1972_v56, 1e-24 }
 0x52f   : > { %2743 = vrsqrt.f32 %v1973_v57 }
 0x53c   : > { %v2744_v58 = vpop.eup %2743 }
 0x53d   : > { %v1975_v59 = vmul.f32 %v2744_v58, %v1968_v51 }
 0x53f   : > { %v1977_v61 = vsub.f32 %v1975_v59, %v2999_v7 }
 0x541   : > { %v1984_v62 = vmul.f32 %v2368_v60, %v1977_v61 }
 0x543   : > { %v1985_v63 = vadd.f32 %v1984_v62, %v2999_v7  ;;  %v2723_v7 = vld [vmem:[%s3355_s11 + $0x18] sm:$0xff]  }
 0x544   : > { %2629 = vmatpush3.bf16.msra.mxu1 %v2723_v7 }
 0x545   : > { %v1986_v0 = vmul.f32 %v1985_v63, %v1985_v63  ;;  %2630 = vmatprep.subr.bf16.mxu1 %v2829_v1 }
 0x547   : > { %v1987_v2 = vsel %vm534_vm1, %v1986_v0, 0.0 }
 0x548   : > { %1988 = vadd.xlane.f32.xlu1 %v1987_v2  ;;  %2631 = vmatpush3.bf16.msra.mxu1 %v2724_v5 }
 0x549   : > { %2632 = vmatprep.subr.bf16.mxu1 %v2829_v1 }
 0x54c   : > { %2633 = vmatpush3.bf16.msra.mxu1 %v2725_v12 }
 0x54d   : > { %2634 = vmatprep.subr.bf16.mxu1 %v2829_v1  ;;  %v2373_v1 = vld [vmem:[%s3356_s12] ss:$0 sm:$0xff] }
 0x550   : > { %2635 = vmatpush3.bf16.msra.mxu1 %v2726_v13 }
 0x5d1   : > { %v1989_v6 = vpop.xlane.xlu1 %1988 }
 0x5d2   : > { %v1990_v8 = vmax.f32 %v1989_v6, 1e-24 }
 0x5d4   : > { %2745 = vrsqrt.f32 %v1990_v8 }
 0x5e1   : > { %v2746_v9 = vpop.eup %2745 }
 0x5e2   : > { %v1992_v10 = vmul.f32 %v2746_v9, %v1985_v63 }
 0x5e4   : > { %v1993_v11 = vpack.c.bf16 %v1992_v10, %v1992_v10 }
 0x5e6   : > { %2625 = vmatmul.mubr.msk.bf16.vlgmr.msra.gmra.mxu0 %vm534_vm1, %v1993_v11 }
 0x6a6   : > { %v2054_v15 = vpop.f32.mrf.mxu0 }
 0x6a7   : > { %v2055_v16 = vadd.f32 %v2369_v14, %v2054_v15 }
 0x6a8   : > { %v2626_v17 = vpop.f32.mrf.mxu0 }
 0x6a9   : > { %v2060_v18 = vmax.f32 %v2055_v16, 0.0 }
 0x6aa   : > { %v2057_v19 = vpop.f32.mrf.mxu0 }
 0x6ab   : > { %v2061_v20 = vpack.c.bf16 %v2060_v18, %v2060_v18 }
 0x6ac   : > { %v2627_v21 = vpop.f32.mrf.mxu0 }
 0x6ad   : > { %2637 = vmatmul.mubr.msk.bf16.vlgmr.msra.gmra.mxu1 %vm2101_vm5, %v2061_v20 }
 0x76d   : > { %v2139_v22 = vpop.f32.mrf.mxu1 }
 0x76e   : > { %v2140_v23 = vadd.f32 %v2373_v1, %v2139_v22 }
 0x76f   : > { %v2638_v24 = vpop.f32.mrf.mxu1 }
 0x770   : > { %v2145_v25 = vmul.f32 %v2140_v23, %v2140_v23 }
 0x771   : > { %v2142_v26 = vpop.f32.mrf.mxu1 }
 0x772   : > { %v2146_v27 = vsel %vm534_vm1, %v2145_v25, 0.0 }
 0x773   : > { %2147 = vadd.xlane.f32.xlu0 %v2146_v27  ;;  %v2639_v28 = vpop.f32.mrf.mxu1 }
 0x7fc   : > { %v2148_v29 = vpop.xlane.xlu0 %2147 }
 0x7fd   : > { %v2149_v30 = vmax.f32 %v2148_v29, 1e-24 }
 0x7ff   : > { %2747 = vrsqrt.f32 %v2149_v30 }
 0x80c   : > { %v2748_v31 = vpop.eup %2747 }
 0x80d   : > { %v2151_v32 = vmul.f32 %v2748_v31, %v2140_v23 }
 0x80f   : > { %v2153_v34 = vsub.f32 %v2151_v32, %v1992_v10 }
 0x811   : > { %v2160_v35 = vmul.f32 %v2379_v33, %v2153_v34 }
 0x813   : > { %v2161_v36 = vadd.f32 %v2160_v35, %v1992_v10 }
 0x815   : > { %v2162_v37 = vmul.f32 %v2161_v36, %v2161_v36 }
 0x817   : > { %v2163_v38 = vsel %vm534_vm1, %v2162_v37, 0.0 }
 0x818   : > { %2164 = vadd.xlane.f32.xlu1 %v2163_v38 }
 0x8a1   : > { %v2165_v39 = vpop.xlane.xlu1 %2164 }
 0x8a2   : > { %v2166_v40 = vmax.f32 %v2165_v39, 1e-24 }
 0x8a4   : > { %2749 = vrsqrt.f32 %v2166_v40 }
 0x8b1   : > { %v2750_v41 = vpop.eup %2749 }
 0x8b2   : > { %v2168_v42 = vmul.f32 %v2750_v41, %v2161_v36 }
 0x8b4   : > { %2169 = vst.msk [vmem:[%s499_s25] sm:$0xff] %vm534_vm1, %v2168_v42 }
 0x8b5   : > { %2764 = shalt.err (!%p2761_p5)
}
 0x8b6   : > { %s2765_s16 = scalar_lea.hbm %s2183_s17, 128  ;;  %s2769_s25 = scalar_lea.hbm %s3359_s15, 256 }
 0x8b7   : > { %p2766_p6 = scmp.ne.s32.totalorder %s2183_s17, %s2765_s16  ;;  %p2770_p10 = scmp.lt.s32.totalorder %s2183_s17, %s3359_s15 }
 0x8b8   : > { %p2771_p11 = scmp.lt.s32.totalorder %s2769_s25, %s2765_s16 }
 0x8b9   : > { %p2767_p7 = pnand %p2766_p6, %p2952_p4 }
 0x8ba   : > { %p2772_p12 = por %p2771_p11, %p2770_p10 }
 0x8bb   : > { %p2768_p9 = pneg %p2767_p7 }
 0x8bd   : > { %p2773_p13 = pnand %p2772_p12, %p2768_p9 }
 0x8bf   : > { %2776 = shalt.err (!%p2773_p13)
}
 0x8c0   : > { %2640 = dma.vmem_to_hbm [thread:$0]  (%p2952_p4), %s2186_s26, 128, %s2183_s17, %s2171_s24  }
 0x8c1 PF: > { %p2646_p0 = scmp.ge.s32.totalorder %s2827_s23, 2  ;;  %s2197_s0 = sand.u32 1, %s2807_s18  }
 0x8c2   : > { %s2198_s1 = scalar_lea.sflag [#allocation6], %s2197_s0 }
 0x8c3   : > { %p2643_p1 = pnand %p2646_p0, %p2959_p8 }
 0x8c5   : > { %p2644_p2 = pneg %p2643_p1 }
 0x8c7   : > { %2802 = dma.done.wait (%p2644_p2), %s2198_s1, 128  }
 0x8c8   : > { %2804 = vsyncadd (%p2644_p2), %s2198_s1, 4294967168  ;;  %s28_s23 = sadd.s32 1, %s2827_s23   ;;  %s3375_s2 = sld [smem:[#allocation8_spill]] }
 0x8c9   : > { %p25_p3 = scmp.ge.s32.totalorder %s28_s23, 4   ;;  %s3376_s20 = sld [smem:[#allocation11_spill]] }
 0x8ca   : > { %s3377_s21 = sld [smem:[#allocation9_spill]]  ;;  %s3379_s18 = smov %s2811_s19 }
 0x8cb   : > { %s3378_s22 = sld [smem:[#allocation10_spill]]  ;;  %27 = sbr.rel (!%p25_p3) target bundleno = 8 (0x8), region = 147 }
 0x8ce   : > { %s3380_s19 = smov %s3375_s2 }
 0x8d0   :  { %2203 = vsyncpa [#allocation6], 1 }
 0x8d1   :  { %2205 = vsyncpa [#allocation6 + $0x1], 1 }

</bundles_post_ra>
